<compile_context>
chip_gen: v5e
topology: v5e:2x2
jax: 0.10.0
libtpu: 0.0.40
codegen_flags: <defaults>
</compile_context>

<pallas_src>
import functools
import math

import jax
import jax.numpy as jnp
from jax import lax
from jax.experimental import pallas as pl
from jax.experimental.pallas import tpu as pltpu

LN_EPS = 1e-5  # nn.LayerNorm default eps


# ----------------------------- shared math helpers --------------------------
def _layernorm(x, gamma, beta):
    """LayerNorm over last dim; single-pass variance, biased (torch default)."""
    mean = jnp.mean(x, axis=-1, keepdims=True)
    msq = jnp.mean(x * x, axis=-1, keepdims=True)
    var = jnp.maximum(msq - mean * mean, 0.0)
    return (x - mean) * lax.rsqrt(var + LN_EPS) * gamma + beta


def _gelu_tanh(x):
    c = math.sqrt(2.0 / math.pi)
    return 0.5 * x * (1.0 + jnp.tanh(c * (x + 0.044715 * x * x * x)))


# ------------------------------- fused Pallas kernel ------------------------
def _vit_fused_kernel(patches_ref, wp_ref, bp_ref, pos_ref,
                      g1_ref, b1_ref, wqkv_ref, wo_ref, bo_ref,
                      g2_ref, b2_ref, w1_ref, bm1_ref, w2_ref, bm2_ref,
                      gf_ref, bf_ref,
                      hs_ref, out_ref,
                      x_vmem, *, num_heads):
    l = pl.program_id(1)

    # ----- patch embedding (only on the first layer step of each sample) -----
    @pl.when(l == 0)
    def _():
        y = jnp.dot(patches_ref[...].astype(jnp.bfloat16), wp_ref[...],
                    preferred_element_type=jnp.float32)
        x_vmem[...] = y + bp_ref[...] + pos_ref[...]

    x = x_vmem[...]                                    # (S, H) f32, VMEM-resident
    S, H = x.shape
    hd = H // num_heads
    scale = 1.0 / math.sqrt(hd)

    # ----------- self-attention: pre-LN, fused QKV, per-head o-proj ----------
    h = _layernorm(x, g1_ref[...], b1_ref[...]).astype(jnp.bfloat16)
    qkv = jnp.dot(h, wqkv_ref[...], preferred_element_type=jnp.float32)  # (S,3H)

    wo = wo_ref[...]                                   # (H, H) bf16
    attn = jnp.zeros((S, H), jnp.float32)
    for i in range(num_heads):
        q = qkv[:, i * hd:(i + 1) * hd]
        k = qkv[:, H + i * hd:H + (i + 1) * hd]
        v = qkv[:, 2 * H + i * hd:2 * H + (i + 1) * hd]
        # scores = q @ k^T without materializing the transpose
        s = lax.dot_general(q.astype(jnp.bfloat16), k.astype(jnp.bfloat16),
                            (((1,), (1,)), ((), ())),
                            preferred_element_type=jnp.float32) * scale   # (S,S)
        s = s - jnp.max(s, axis=-1, keepdims=True)
        p = jnp.exp(s)
        p = p * pl.reciprocal(jnp.sum(p, axis=-1, keepdims=True), approx=True)
        o_i = jnp.dot(p.astype(jnp.bfloat16), v.astype(jnp.bfloat16),
                      preferred_element_type=jnp.float32)                 # (S,hd)
        # partial output projection: lane-dense (S, H) accumulation, no concat
        attn = attn + jnp.dot(o_i.astype(jnp.bfloat16),
                              wo[i * hd:(i + 1) * hd, :],
                              preferred_element_type=jnp.float32)
    x = x + attn + bo_ref[...]

    # --------------------------------- MLP -----------------------------------
    h2 = _layernorm(x, g2_ref[...], b2_ref[...]).astype(jnp.bfloat16)
    m = jnp.dot(h2, w1_ref[...], preferred_element_type=jnp.float32) + bm1_ref[...]
    m = _gelu_tanh(m)
    m = jnp.dot(m.astype(jnp.bfloat16), w2_ref[...],
                preferred_element_type=jnp.float32) + bm2_ref[...]
    x = x + m

    x_vmem[...] = x                     # carry to next layer step
    hs_ref[...] = x.astype(hs_ref.dtype)  # stream this layer's hidden state out

    # ----- final LayerNorm (only on the last layer step of each sample) -----
    @pl.when(l == pl.num_programs(1) - 1)
    def _():
        out_ref[...] = _layernorm(x, gf_ref[...], bf_ref[...]).astype(out_ref.dtype)


# ------------------------------ Pallas wrapper -------------------------------
def _pallas_vit_fused(patches, params, *, num_heads):
    N, S, P = patches.shape
    H = params["pos"].shape[-1]
    L = params["wqkv"].shape[0]
    M = params["w1"].shape[-1]

    kernel = functools.partial(_vit_fused_kernel, num_heads=num_heads)

    def rep(shape):          # operand replicated across the whole grid
        nd = len(shape)
        return pl.BlockSpec(shape, lambda n, l, _nd=nd: (0,) * _nd)

    def per_layer(shape):    # stacked per-layer operand, leading L dim squeezed
        nd = len(shape)
        return pl.BlockSpec((None,) + shape,
                            lambda n, l, _nd=nd: (l,) + (0,) * _nd)

    grid_spec = pltpu.PrefetchScalarGridSpec(
        num_scalar_prefetch=0,
        grid=(N, L),
        in_specs=[
            pl.BlockSpec((None, S, P), lambda n, l: (n, 0, 0)),   # patches
            rep((P, H)),                                          # w_patch (bf16)
            rep((1, H)),                                          # b_patch
            rep((S, H)),                                          # pos emb
            per_layer((1, H)),                                    # ln1 gamma
            per_layer((1, H)),                                    # ln1 beta
            per_layer((H, 3 * H)),                                # fused qkv W (bf16)
            per_layer((H, H)),                                    # out-proj W (bf16)
            per_layer((1, H)),                                    # out-proj b
            per_layer((1, H)),                                    # ln2 gamma
            per_layer((1, H)),                                    # ln2 beta
            per_layer((H, M)),                                    # mlp fc1 W (bf16)
            per_layer((1, M)),                                    # mlp fc1 b
            per_layer((M, H)),                                    # mlp fc2 W (bf16)
            per_layer((1, H)),                                    # mlp fc2 b
            rep((1, H)),                                          # final ln gamma
            rep((1, H)),                                          # final ln beta
        ],
        out_specs=(
            pl.BlockSpec((None, None, S, H), lambda n, l: (l, n, 0, 0)),  # hidden
            pl.BlockSpec((None, S, H), lambda n, l: (n, 0, 0)),           # final
        ),
        scratch_shapes=[pltpu.VMEM((S, H), jnp.float32)],         # resident x
    )

    hs, out = pl.pallas_call(
        kernel,
        out_shape=(jax.ShapeDtypeStruct((L, N, S, H), jnp.float32),
                   jax.ShapeDtypeStruct((N, S, H), jnp.float32)),
        grid_spec=grid_spec,
        compiler_params=pltpu.CompilerParams(
            dimension_semantics=("parallel", "arbitrary")),
    )(patches,
      params["w_patch"].astype(jnp.bfloat16), params["b_patch"], params["pos"],
      params["g1"], params["b1"],
      params["wqkv"].astype(jnp.bfloat16),
      params["wo"].astype(jnp.bfloat16), params["bo"],
      params["g2"], params["b2"],
      params["w1"].astype(jnp.bfloat16), params["bm1"],
      params["w2"].astype(jnp.bfloat16), params["bm2"],
      params["gf"], params["bf"])

    return out, [hs[i] for i in range(L)]


# ------------------------------- model wrapper -------------------------------
def _extract_patches(x_nchw, patch_size):
    """Strided-conv patch embedding == im2col: (N,C,H,W) -> (N, S, C*ph*pw)."""
    N, C, Hi, Wi = x_nchw.shape
    ph = pw = patch_size
    nh, nw = Hi // ph, Wi // pw
    x = x_nchw.reshape(N, C, nh, ph, nw, pw)
    x = jnp.transpose(x, (0, 2, 4, 1, 3, 5))            # (N, nh, nw, C, ph, pw)
    return x.reshape(N, nh * nw, C * ph * pw)


def vit_forward(x_nchw, params, *, patch_size, num_heads):
    patches = _extract_patches(x_nchw, patch_size)       # im2col once, in XLA
    return _pallas_vit_fused(patches, params, num_heads=num_heads)


# -------------------------------- parameters ---------------------------------
def init_params(key, *, in_channels, img_size, patch_size, hidden, mlp_dim,
                num_layers):
    P = in_channels * patch_size * patch_size
    S = (img_size // patch_size) ** 2
    L = num_layers
    keys = iter(jax.random.split(key, 32))

    def nrm(shape, scale):
        return scale * jax.random.normal(next(keys), shape, jnp.float32)

    # per-layer parameters stacked on a leading layer axis (weights pipelined
    # across the inner "arbitrary" grid dim in the fused kernel).
    return {
        "w_patch": nrm((P, hidden), 1.0 / math.sqrt(P)),
        "b_patch": nrm((1, hidden), 0.02),
        "pos": nrm((S, hidden), 0.02),
        "gf": 1.0 + nrm((1, hidden), 0.05),
        "bf": nrm((1, hidden), 0.05),
        "g1": 1.0 + nrm((L, 1, hidden), 0.05),
        "b1": nrm((L, 1, hidden), 0.05),
        "wqkv": nrm((L, hidden, 3 * hidden), 1.0 / math.sqrt(hidden)),
        "wo": nrm((L, hidden, hidden), 1.0 / math.sqrt(hidden)),
        "bo": nrm((L, 1, hidden), 0.02),
        "g2": 1.0 + nrm((L, 1, hidden), 0.05),
        "b2": nrm((L, 1, hidden), 0.05),
        "w1": nrm((L, hidden, mlp_dim), 1.0 / math.sqrt(hidden)),
        "bm1": nrm((L, 1, mlp_dim), 0.02),
        "w2": nrm((L, mlp_dim, hidden), 1.0 / math.sqrt(mlp_dim)),
        "bm2": nrm((L, 1, hidden), 0.02),
    }


# -------------------------------- pure-JAX reference -------------------------
_HI = lax.Precision.HIGHEST


def _reference_forward(x_nchw, params, *, patch_size, num_heads):
    patches = _extract_patches(x_nchw, patch_size)
    x = jnp.einsum("nsp,ph->nsh", patches, params["w_patch"], precision=_HI)
    x = x + params["b_patch"] + params["pos"]
    H = x.shape[-1]
    hd = H // num_heads
    L = params["wqkv"].shape[0]
    hidden_states = []
    for i in range(L):
        h = _layernorm(x, params["g1"][i], params["b1"][i])
        qkv = jnp.einsum("nsh,hk->nsk", h, params["wqkv"][i], precision=_HI)
        q, k, v = jnp.split(qkv, 3, axis=-1)
        N, S, _ = q.shape
        q = q.reshape(N, S, num_heads, hd)
        k = k.reshape(N, S, num_heads, hd)
        v = v.reshape(N, S, num_heads, hd)
        s = jnp.einsum("nqhd,nkhd->nhqk", q, k, precision=_HI) / math.sqrt(hd)
        a = jax.nn.softmax(s, axis=-1)
        o = jnp.einsum("nhqk,nkhd->nqhd", a, v, precision=_HI).reshape(N, S, H)
        attn = jnp.einsum("nsh,hk->nsk", o, params["wo"][i],
                          precision=_HI) + params["bo"][i]
        x = x + attn
        h2 = _layernorm(x, params["g2"][i], params["b2"][i])
        m = jnp.einsum("nsh,hm->nsm", h2, params["w1"][i],
                       precision=_HI) + params["bm1"][i]
        m = _gelu_tanh(m)
        m = jnp.einsum("nsm,mh->nsh", m, params["w2"][i],
                       precision=_HI) + params["bm2"][i]
        x = x + m
        hidden_states.append(x)
    x = _layernorm(x, params["gf"], params["bf"])
    return x, hidden_states


# ------------------------------------ main -----------------------------------
if __name__ == "__main__":
    # ViT(in_channels=3, img_size=(16,16), patch_size=(4,4), hidden_size=128,
    #     mlp_dim=256, num_layers=2, num_heads=4, spatial_dims=2,
    #     classification=False, dropout_rate=0.0)
    N, C_IN, IMG, PATCH = 2, 3, 16, 4
    HIDDEN, MLP, LAYERS, HEADS = 128, 256, 2, 4

    key = jax.random.PRNGKey(0)
    kx, kp = jax.random.split(key)
    x = jax.random.normal(kx, (N, C_IN, IMG, IMG), dtype=jnp.float32)
    params = init_params(kp, in_channels=C_IN, img_size=IMG, patch_size=PATCH,
                         hidden=HIDDEN, mlp_dim=MLP, num_layers=LAYERS)

    fwd = jax.jit(functools.partial(vit_forward, patch_size=PATCH,
                                    num_heads=HEADS))
    out, hidden = fwd(x, params)
    out = jax.block_until_ready(out)

    ref_out, ref_hidden = _reference_forward(x, params, patch_size=PATCH,
                                             num_heads=HEADS)

    S = (IMG // PATCH) ** 2
    assert out.shape == (N, S, HIDDEN), out.shape
    assert len(hidden) == LAYERS
    # Kernel uses bf16 MXU operands with f32 accumulation (perf review item);
    # reference uses f32 HIGHEST precision, so tolerance is set for bf16.
    ATOL = RTOL = 5e-2
    for h_k, h_r in zip(hidden, ref_hidden):
        assert h_k.shape == (N, S, HIDDEN), h_k.shape
        assert jnp.allclose(h_k, h_r, atol=ATOL, rtol=RTOL), \
            float(jnp.max(jnp.abs(h_k - h_r)))
    assert jnp.allclose(out, ref_out, atol=ATOL, rtol=RTOL), \
        float(jnp.max(jnp.abs(out - ref_out)))
    print("KERNEL_OK")
</pallas_src>

<mosaic_0001>
module attributes {stable_mosaic.version = 11 : i64} {
  func.func @_vit_fused_kernel(%arg0: i32, %arg1: i32, %arg2: memref<1x16x48xf32, #tpu.memory_space<vmem>>, %arg3: memref<48x128xbf16, #tpu.memory_space<vmem>>, %arg4: memref<1x128xf32, #tpu.memory_space<vmem>>, %arg5: memref<16x128xf32, #tpu.memory_space<vmem>>, %arg6: memref<1x1x128xf32, #tpu.memory_space<vmem>>, %arg7: memref<1x1x128xf32, #tpu.memory_space<vmem>>, %arg8: memref<1x128x384xbf16, #tpu.memory_space<vmem>>, %arg9: memref<1x128x128xbf16, #tpu.memory_space<vmem>>, %arg10: memref<1x1x128xf32, #tpu.memory_space<vmem>>, %arg11: memref<1x1x128xf32, #tpu.memory_space<vmem>>, %arg12: memref<1x1x128xf32, #tpu.memory_space<vmem>>, %arg13: memref<1x128x256xbf16, #tpu.memory_space<vmem>>, %arg14: memref<1x1x256xf32, #tpu.memory_space<vmem>>, %arg15: memref<1x256x128xbf16, #tpu.memory_space<vmem>>, %arg16: memref<1x1x128xf32, #tpu.memory_space<vmem>>, %arg17: memref<1x128xf32, #tpu.memory_space<vmem>>, %arg18: memref<1x128xf32, #tpu.memory_space<vmem>>, %arg19: memref<1x1x16x128xf32, #tpu.memory_space<vmem>>, %arg20: memref<1x16x128xf32, #tpu.memory_space<vmem>>, %arg21: memref<16x128xf32, #tpu.memory_space<vmem>>) attributes {dimension_semantics = [#tpu.dimension_semantics<parallel>, #tpu.dimension_semantics<arbitrary>], iteration_bounds = array<i64: 2, 2>, scalar_prefetch = 0 : i64, scratch_operands = 1 : i64, tpu.core_type = #tpu.core_type<tc>, window_params = [{transform_indices = @transform_0, window_bounds = array<i64: 1, 16, 48>}, {pipeline_mode = #tpu.pipeline_mode<synchronous>, transform_indices = @transform_1, window_bounds = array<i64: 48, 128>}, {pipeline_mode = #tpu.pipeline_mode<synchronous>, transform_indices = @transform_2, window_bounds = array<i64: 1, 128>}, {pipeline_mode = #tpu.pipeline_mode<synchronous>, transform_indices = @transform_3, window_bounds = array<i64: 16, 128>}, {transform_indices = @transform_4, window_bounds = array<i64: 1, 1, 128>}, {transform_indices = @transform_5, window_bounds = array<i64: 1, 1, 128>}, {transform_indices = @transform_6, window_bounds = array<i64: 1, 128, 384>}, {transform_indices = @transform_7, window_bounds = array<i64: 1, 128, 128>}, {transform_indices = @transform_8, window_bounds = array<i64: 1, 1, 128>}, {transform_indices = @transform_9, window_bounds = array<i64: 1, 1, 128>}, {transform_indices = @transform_10, window_bounds = array<i64: 1, 1, 128>}, {transform_indices = @transform_11, window_bounds = array<i64: 1, 128, 256>}, {transform_indices = @transform_12, window_bounds = array<i64: 1, 1, 256>}, {transform_indices = @transform_13, window_bounds = array<i64: 1, 256, 128>}, {transform_indices = @transform_14, window_bounds = array<i64: 1, 1, 128>}, {pipeline_mode = #tpu.pipeline_mode<synchronous>, transform_indices = @transform_15, window_bounds = array<i64: 1, 128>}, {pipeline_mode = #tpu.pipeline_mode<synchronous>, transform_indices = @transform_16, window_bounds = array<i64: 1, 128>}, {transform_indices = @transform_17, window_bounds = array<i64: 1, 1, 16, 128>}, {transform_indices = @transform_18, window_bounds = array<i64: 1, 16, 128>}]} {
    %c0_i32 = arith.constant 0 : i32
    %0 = arith.cmpi eq, %arg1, %c0_i32 : i32
    %1 = arith.extui %0 : i1 to i32
    %c0_i32_0 = arith.constant 0 : i32
    %2 = arith.cmpi ne, %1, %c0_i32_0 : i32
    scf.if %2 {
      %c0_85 = arith.constant 0 : index
      %c0_86 = arith.constant 0 : index
      %c0_87 = arith.constant 0 : index
      %209 = vector.load %arg2[%c0_85, %c0_86, %c0_87] : memref<1x16x48xf32, #tpu.memory_space<vmem>>, vector<1x16x48xf32>
      %210 = vector.shape_cast %209 : vector<1x16x48xf32> to vector<16x48xf32>
      %211 = arith.truncf %210 : vector<16x48xf32> to vector<16x48xbf16>
      %c0_88 = arith.constant 0 : index
      %c0_89 = arith.constant 0 : index
      %212 = vector.load %arg3[%c0_88, %c0_89] : memref<48x128xbf16, #tpu.memory_space<vmem>>, vector<48x128xbf16>
      %cst_90 = arith.constant dense<0.000000e+00> : vector<16x128xf32>
      %213 = tpu.matmul %211, %212, %cst_90 {dimension_numbers = #tpu.dot_dimension_numbers<[1], [0], [0], [1], [0, 0, 1, 1], [], []>} : vector<16x48xbf16>, vector<48x128xbf16>, vector<16x128xf32> -> vector<16x128xf32>
      %c0_91 = arith.constant 0 : index
      %c0_92 = arith.constant 0 : index
      %214 = vector.load %arg4[%c0_91, %c0_92] : memref<1x128xf32, #tpu.memory_space<vmem>>, vector<1x128xf32>
      %215 = vector.broadcast %214 : vector<1x128xf32> to vector<16x128xf32>
      %216 = arith.addf %213, %215 : vector<16x128xf32>
      %c0_93 = arith.constant 0 : index
      %c0_94 = arith.constant 0 : index
      %217 = vector.load %arg5[%c0_93, %c0_94] : memref<16x128xf32, #tpu.memory_space<vmem>>, vector<16x128xf32>
      %218 = arith.addf %216, %217 : vector<16x128xf32>
      %c0_95 = arith.constant 0 : index
      %c0_96 = arith.constant 0 : index
      %219 = vector.load %arg21[%c0_95, %c0_96] : memref<16x128xf32, #tpu.memory_space<vmem>>, vector<16x128xf32>
      tpu.vector_store %arg21[%c0_95, %c0_96], %218 {strides = array<i32>} : memref<16x128xf32, #tpu.memory_space<vmem>>, vector<16x128xf32>,
    } else {
    }
    %c0 = arith.constant 0 : index
    %c0_1 = arith.constant 0 : index
    %3 = vector.load %arg21[%c0, %c0_1] : memref<16x128xf32, #tpu.memory_space<vmem>>, vector<16x128xf32>
    %c0_2 = arith.constant 0 : index
    %c0_3 = arith.constant 0 : index
    %c0_4 = arith.constant 0 : index
    %4 = vector.load %arg6[%c0_2, %c0_3, %c0_4] : memref<1x1x128xf32, #tpu.memory_space<vmem>>, vector<1x1x128xf32>
    %5 = vector.shape_cast %4 : vector<1x1x128xf32> to vector<1x128xf32>
    %c0_5 = arith.constant 0 : index
    %c0_6 = arith.constant 0 : index
    %c0_7 = arith.constant 0 : index
    %6 = vector.load %arg7[%c0_5, %c0_6, %c0_7] : memref<1x1x128xf32, #tpu.memory_space<vmem>>, vector<1x1x128xf32>
    %7 = vector.shape_cast %6 : vector<1x1x128xf32> to vector<1x128xf32>
    %cst = arith.constant dense<0.000000e+00> : vector<16xf32>
    %8 = vector.multi_reduction <add>, %3, %cst [1] : vector<16x128xf32> to vector<16xf32>
    %9 = vector.shape_cast %8 : vector<16xf32> to vector<16x1xf32>
    %cst_8 = arith.constant 1.280000e+02 : f32
    %10 = vector.broadcast %cst_8 : f32 to vector<16x1xf32>
    %11 = arith.divf %9, %10 : vector<16x1xf32>
    %12 = arith.mulf %3, %3 : vector<16x128xf32>
    %cst_9 = arith.constant dense<0.000000e+00> : vector<16xf32>
    %13 = vector.multi_reduction <add>, %12, %cst_9 [1] : vector<16x128xf32> to vector<16xf32>
    %14 = vector.shape_cast %13 : vector<16xf32> to vector<16x1xf32>
    %cst_10 = arith.constant 1.280000e+02 : f32
    %15 = vector.broadcast %cst_10 : f32 to vector<16x1xf32>
    %16 = arith.divf %14, %15 : vector<16x1xf32>
    %17 = arith.mulf %11, %11 : vector<16x1xf32>
    %18 = arith.subf %16, %17 : vector<16x1xf32>
    %cst_11 = arith.constant 0.000000e+00 : f32
    %19 = vector.broadcast %cst_11 : f32 to vector<16x1xf32>
    %20 = arith.maximumf %18, %19 : vector<16x1xf32>
    %21 = vector.broadcast %11 : vector<16x1xf32> to vector<16x128xf32>
    %22 = arith.subf %3, %21 : vector<16x128xf32>
    %cst_12 = arith.constant 9.99999974E-6 : f32
    %23 = vector.broadcast %cst_12 : f32 to vector<16x1xf32>
    %24 = arith.addf %20, %23 : vector<16x1xf32>
    %25 = math.rsqrt %24 : vector<16x1xf32>
    %26 = vector.broadcast %25 : vector<16x1xf32> to vector<16x128xf32>
    %27 = arith.mulf %22, %26 : vector<16x128xf32>
    %28 = vector.broadcast %5 : vector<1x128xf32> to vector<16x128xf32>
    %29 = arith.mulf %27, %28 : vector<16x128xf32>
    %30 = vector.broadcast %7 : vector<1x128xf32> to vector<16x128xf32>
    %31 = arith.addf %29, %30 : vector<16x128xf32>
    %32 = arith.truncf %31 : vector<16x128xf32> to vector<16x128xbf16>
    %c0_13 = arith.constant 0 : index
    %c0_14 = arith.constant 0 : index
    %c0_15 = arith.constant 0 : index
    %33 = vector.load %arg8[%c0_13, %c0_14, %c0_15] : memref<1x128x384xbf16, #tpu.memory_space<vmem>>, vector<1x128x384xbf16>
    %34 = vector.shape_cast %33 : vector<1x128x384xbf16> to vector<128x384xbf16>
    %cst_16 = arith.constant dense<0.000000e+00> : vector<16x384xf32>
    %35 = tpu.matmul %32, %34, %cst_16 {dimension_numbers = #tpu.dot_dimension_numbers<[1], [0], [0], [1], [0, 0, 1, 1], [], []>} : vector<16x128xbf16>, vector<128x384xbf16>, vector<16x384xf32> -> vector<16x384xf32>
    %c0_17 = arith.constant 0 : index
    %c0_18 = arith.constant 0 : index
    %c0_19 = arith.constant 0 : index
    %36 = vector.load %arg9[%c0_17, %c0_18, %c0_19] : memref<1x128x128xbf16, #tpu.memory_space<vmem>>, vector<1x128x128xbf16>
    %37 = vector.shape_cast %36 : vector<1x128x128xbf16> to vector<128x128xbf16>
    %cst_20 = arith.constant 0.000000e+00 : f32
    %38 = vector.broadcast %cst_20 : f32 to vector<16x128xf32>
    %39 = vector.extract_strided_slice %35 {offsets = [0, 0], sizes = [16, 32], strides = [1, 1]} : vector<16x384xf32> to vector<16x32xf32>
    %40 = vector.extract_strided_slice %35 {offsets = [0, 128], sizes = [16, 32], strides = [1, 1]} : vector<16x384xf32> to vector<16x32xf32>
    %41 = vector.extract_strided_slice %35 {offsets = [0, 256], sizes = [16, 32], strides = [1, 1]} : vector<16x384xf32> to vector<16x32xf32>
    %42 = arith.truncf %39 : vector<16x32xf32> to vector<16x32xbf16>
    %43 = arith.truncf %40 : vector<16x32xf32> to vector<16x32xbf16>
    %cst_21 = arith.constant dense<0.000000e+00> : vector<16x16xf32>
    %44 = tpu.matmul %42, %43, %cst_21 {dimension_numbers = #tpu.dot_dimension_numbers<[1], [1], [0], [0], [0, 0, 1, 0], [], []>} : vector<16x32xbf16>, vector<16x32xbf16>, vector<16x16xf32> -> vector<16x16xf32>
    %cst_22 = arith.constant 0.176776692 : f32
    %45 = vector.broadcast %cst_22 : f32 to vector<16x16xf32>
    %46 = arith.mulf %44, %45 : vector<16x16xf32>
    %cst_23 = arith.constant dense<0xFF800000> : vector<16xf32>
    %47 = vector.multi_reduction <maximumf>, %46, %cst_23 [1] : vector<16x16xf32> to vector<16xf32>
    %48 = vector.shape_cast %47 : vector<16xf32> to vector<16x1xf32>
    %49 = vector.broadcast %48 : vector<16x1xf32> to vector<16x16xf32>
    %50 = arith.subf %46, %49 : vector<16x16xf32>
    %51 = math.exp %50 : vector<16x16xf32>
    %cst_24 = arith.constant dense<0.000000e+00> : vector<16xf32>
    %52 = vector.multi_reduction <add>, %51, %cst_24 [1] : vector<16x16xf32> to vector<16xf32>
    %53 = vector.shape_cast %52 : vector<16xf32> to vector<16x1xf32>
    %54 = tpu.reciprocal %53 {approx = true} : vector<16x1xf32> -> vector<16x1xf32>
    %55 = vector.broadcast %54 : vector<16x1xf32> to vector<16x16xf32>
    %56 = arith.mulf %51, %55 : vector<16x16xf32>
    %57 = arith.truncf %56 : vector<16x16xf32> to vector<16x16xbf16>
    %58 = arith.truncf %41 : vector<16x32xf32> to vector<16x32xbf16>
    %cst_25 = arith.constant dense<0.000000e+00> : vector<16x32xf32>
    %59 = tpu.matmul %57, %58, %cst_25 {dimension_numbers = #tpu.dot_dimension_numbers<[1], [0], [0], [1], [0, 0, 1, 1], [], []>} : vector<16x16xbf16>, vector<16x32xbf16>, vector<16x32xf32> -> vector<16x32xf32>
    %60 = arith.truncf %59 : vector<16x32xf32> to vector<16x32xbf16>
    %61 = vector.extract_strided_slice %37 {offsets = [0, 0], sizes = [32, 128], strides = [1, 1]} : vector<128x128xbf16> to vector<32x128xbf16>
    %cst_26 = arith.constant dense<0.000000e+00> : vector<16x128xf32>
    %62 = tpu.matmul %60, %61, %cst_26 {dimension_numbers = #tpu.dot_dimension_numbers<[1], [0], [0], [1], [0, 0, 1, 1], [], []>} : vector<16x32xbf16>, vector<32x128xbf16>, vector<16x128xf32> -> vector<16x128xf32>
    %63 = arith.addf %38, %62 : vector<16x128xf32>
    %64 = vector.extract_strided_slice %35 {offsets = [0, 32], sizes = [16, 32], strides = [1, 1]} : vector<16x384xf32> to vector<16x32xf32>
    %65 = vector.extract_strided_slice %35 {offsets = [0, 160], sizes = [16, 32], strides = [1, 1]} : vector<16x384xf32> to vector<16x32xf32>
    %66 = vector.extract_strided_slice %35 {offsets = [0, 288], sizes = [16, 32], strides = [1, 1]} : vector<16x384xf32> to vector<16x32xf32>
    %67 = arith.truncf %64 : vector<16x32xf32> to vector<16x32xbf16>
    %68 = arith.truncf %65 : vector<16x32xf32> to vector<16x32xbf16>
    %cst_27 = arith.constant dense<0.000000e+00> : vector<16x16xf32>
    %69 = tpu.matmul %67, %68, %cst_27 {dimension_numbers = #tpu.dot_dimension_numbers<[1], [1], [0], [0], [0, 0, 1, 0], [], []>} : vector<16x32xbf16>, vector<16x32xbf16>, vector<16x16xf32> -> vector<16x16xf32>
    %cst_28 = arith.constant 0.176776692 : f32
    %70 = vector.broadcast %cst_28 : f32 to vector<16x16xf32>
    %71 = arith.mulf %69, %70 : vector<16x16xf32>
    %cst_29 = arith.constant dense<0xFF800000> : vector<16xf32>
    %72 = vector.multi_reduction <maximumf>, %71, %cst_29 [1] : vector<16x16xf32> to vector<16xf32>
    %73 = vector.shape_cast %72 : vector<16xf32> to vector<16x1xf32>
    %74 = vector.broadcast %73 : vector<16x1xf32> to vector<16x16xf32>
    %75 = arith.subf %71, %74 : vector<16x16xf32>
    %76 = math.exp %75 : vector<16x16xf32>
    %cst_30 = arith.constant dense<0.000000e+00> : vector<16xf32>
    %77 = vector.multi_reduction <add>, %76, %cst_30 [1] : vector<16x16xf32> to vector<16xf32>
    %78 = vector.shape_cast %77 : vector<16xf32> to vector<16x1xf32>
    %79 = tpu.reciprocal %78 {approx = true} : vector<16x1xf32> -> vector<16x1xf32>
    %80 = vector.broadcast %79 : vector<16x1xf32> to vector<16x16xf32>
    %81 = arith.mulf %76, %80 : vector<16x16xf32>
    %82 = arith.truncf %81 : vector<16x16xf32> to vector<16x16xbf16>
    %83 = arith.truncf %66 : vector<16x32xf32> to vector<16x32xbf16>
    %cst_31 = arith.constant dense<0.000000e+00> : vector<16x32xf32>
    %84 = tpu.matmul %82, %83, %cst_31 {dimension_numbers = #tpu.dot_dimension_numbers<[1], [0], [0], [1], [0, 0, 1, 1], [], []>} : vector<16x16xbf16>, vector<16x32xbf16>, vector<16x32xf32> -> vector<16x32xf32>
    %85 = arith.truncf %84 : vector<16x32xf32> to vector<16x32xbf16>
    %86 = vector.extract_strided_slice %37 {offsets = [32, 0], sizes = [32, 128], strides = [1, 1]} : vector<128x128xbf16> to vector<32x128xbf16>
    %cst_32 = arith.constant dense<0.000000e+00> : vector<16x128xf32>
    %87 = tpu.matmul %85, %86, %cst_32 {dimension_numbers = #tpu.dot_dimension_numbers<[1], [0], [0], [1], [0, 0, 1, 1], [], []>} : vector<16x32xbf16>, vector<32x128xbf16>, vector<16x128xf32> -> vector<16x128xf32>
    %88 = arith.addf %63, %87 : vector<16x128xf32>
    %89 = vector.extract_strided_slice %35 {offsets = [0, 64], sizes = [16, 32], strides = [1, 1]} : vector<16x384xf32> to vector<16x32xf32>
    %90 = vector.extract_strided_slice %35 {offsets = [0, 192], sizes = [16, 32], strides = [1, 1]} : vector<16x384xf32> to vector<16x32xf32>
    %91 = vector.extract_strided_slice %35 {offsets = [0, 320], sizes = [16, 32], strides = [1, 1]} : vector<16x384xf32> to vector<16x32xf32>
    %92 = arith.truncf %89 : vector<16x32xf32> to vector<16x32xbf16>
    %93 = arith.truncf %90 : vector<16x32xf32> to vector<16x32xbf16>
    %cst_33 = arith.constant dense<0.000000e+00> : vector<16x16xf32>
    %94 = tpu.matmul %92, %93, %cst_33 {dimension_numbers = #tpu.dot_dimension_numbers<[1], [1], [0], [0], [0, 0, 1, 0], [], []>} : vector<16x32xbf16>, vector<16x32xbf16>, vector<16x16xf32> -> vector<16x16xf32>
    %cst_34 = arith.constant 0.176776692 : f32
    %95 = vector.broadcast %cst_34 : f32 to vector<16x16xf32>
    %96 = arith.mulf %94, %95 : vector<16x16xf32>
    %cst_35 = arith.constant dense<0xFF800000> : vector<16xf32>
    %97 = vector.multi_reduction <maximumf>, %96, %cst_35 [1] : vector<16x16xf32> to vector<16xf32>
    %98 = vector.shape_cast %97 : vector<16xf32> to vector<16x1xf32>
    %99 = vector.broadcast %98 : vector<16x1xf32> to vector<16x16xf32>
    %100 = arith.subf %96, %99 : vector<16x16xf32>
    %101 = math.exp %100 : vector<16x16xf32>
    %cst_36 = arith.constant dense<0.000000e+00> : vector<16xf32>
    %102 = vector.multi_reduction <add>, %101, %cst_36 [1] : vector<16x16xf32> to vector<16xf32>
    %103 = vector.shape_cast %102 : vector<16xf32> to vector<16x1xf32>
    %104 = tpu.reciprocal %103 {approx = true} : vector<16x1xf32> -> vector<16x1xf32>
    %105 = vector.broadcast %104 : vector<16x1xf32> to vector<16x16xf32>
    %106 = arith.mulf %101, %105 : vector<16x16xf32>
    %107 = arith.truncf %106 : vector<16x16xf32> to vector<16x16xbf16>
    %108 = arith.truncf %91 : vector<16x32xf32> to vector<16x32xbf16>
    %cst_37 = arith.constant dense<0.000000e+00> : vector<16x32xf32>
    %109 = tpu.matmul %107, %108, %cst_37 {dimension_numbers = #tpu.dot_dimension_numbers<[1], [0], [0], [1], [0, 0, 1, 1], [], []>} : vector<16x16xbf16>, vector<16x32xbf16>, vector<16x32xf32> -> vector<16x32xf32>
    %110 = arith.truncf %109 : vector<16x32xf32> to vector<16x32xbf16>
    %111 = vector.extract_strided_slice %37 {offsets = [64, 0], sizes = [32, 128], strides = [1, 1]} : vector<128x128xbf16> to vector<32x128xbf16>
    %cst_38 = arith.constant dense<0.000000e+00> : vector<16x128xf32>
    %112 = tpu.matmul %110, %111, %cst_38 {dimension_numbers = #tpu.dot_dimension_numbers<[1], [0], [0], [1], [0, 0, 1, 1], [], []>} : vector<16x32xbf16>, vector<32x128xbf16>, vector<16x128xf32> -> vector<16x128xf32>
    %113 = arith.addf %88, %112 : vector<16x128xf32>
    %114 = vector.extract_strided_slice %35 {offsets = [0, 96], sizes = [16, 32], strides = [1, 1]} : vector<16x384xf32> to vector<16x32xf32>
    %115 = vector.extract_strided_slice %35 {offsets = [0, 224], sizes = [16, 32], strides = [1, 1]} : vector<16x384xf32> to vector<16x32xf32>
    %116 = vector.extract_strided_slice %35 {offsets = [0, 352], sizes = [16, 32], strides = [1, 1]} : vector<16x384xf32> to vector<16x32xf32>
    %117 = arith.truncf %114 : vector<16x32xf32> to vector<16x32xbf16>
    %118 = arith.truncf %115 : vector<16x32xf32> to vector<16x32xbf16>
    %cst_39 = arith.constant dense<0.000000e+00> : vector<16x16xf32>
    %119 = tpu.matmul %117, %118, %cst_39 {dimension_numbers = #tpu.dot_dimension_numbers<[1], [1], [0], [0], [0, 0, 1, 0], [], []>} : vector<16x32xbf16>, vector<16x32xbf16>, vector<16x16xf32> -> vector<16x16xf32>
    %cst_40 = arith.constant 0.176776692 : f32
    %120 = vector.broadcast %cst_40 : f32 to vector<16x16xf32>
    %121 = arith.mulf %119, %120 : vector<16x16xf32>
    %cst_41 = arith.constant dense<0xFF800000> : vector<16xf32>
    %122 = vector.multi_reduction <maximumf>, %121, %cst_41 [1] : vector<16x16xf32> to vector<16xf32>
    %123 = vector.shape_cast %122 : vector<16xf32> to vector<16x1xf32>
    %124 = vector.broadcast %123 : vector<16x1xf32> to vector<16x16xf32>
    %125 = arith.subf %121, %124 : vector<16x16xf32>
    %126 = math.exp %125 : vector<16x16xf32>
    %cst_42 = arith.constant dense<0.000000e+00> : vector<16xf32>
    %127 = vector.multi_reduction <add>, %126, %cst_42 [1] : vector<16x16xf32> to vector<16xf32>
    %128 = vector.shape_cast %127 : vector<16xf32> to vector<16x1xf32>
    %129 = tpu.reciprocal %128 {approx = true} : vector<16x1xf32> -> vector<16x1xf32>
    %130 = vector.broadcast %129 : vector<16x1xf32> to vector<16x16xf32>
    %131 = arith.mulf %126, %130 : vector<16x16xf32>
    %132 = arith.truncf %131 : vector<16x16xf32> to vector<16x16xbf16>
    %133 = arith.truncf %116 : vector<16x32xf32> to vector<16x32xbf16>
    %cst_43 = arith.constant dense<0.000000e+00> : vector<16x32xf32>
    %134 = tpu.matmul %132, %133, %cst_43 {dimension_numbers = #tpu.dot_dimension_numbers<[1], [0], [0], [1], [0, 0, 1, 1], [], []>} : vector<16x16xbf16>, vector<16x32xbf16>, vector<16x32xf32> -> vector<16x32xf32>
    %135 = arith.truncf %134 : vector<16x32xf32> to vector<16x32xbf16>
    %136 = vector.extract_strided_slice %37 {offsets = [96, 0], sizes = [32, 128], strides = [1, 1]} : vector<128x128xbf16> to vector<32x128xbf16>
    %cst_44 = arith.constant dense<0.000000e+00> : vector<16x128xf32>
    %137 = tpu.matmul %135, %136, %cst_44 {dimension_numbers = #tpu.dot_dimension_numbers<[1], [0], [0], [1], [0, 0, 1, 1], [], []>} : vector<16x32xbf16>, vector<32x128xbf16>, vector<16x128xf32> -> vector<16x128xf32>
    %138 = arith.addf %113, %137 : vector<16x128xf32>
    %139 = arith.addf %3, %138 : vector<16x128xf32>
    %c0_45 = arith.constant 0 : index
    %c0_46 = arith.constant 0 : index
    %c0_47 = arith.constant 0 : index
    %140 = vector.load %arg10[%c0_45, %c0_46, %c0_47] : memref<1x1x128xf32, #tpu.memory_space<vmem>>, vector<1x1x128xf32>
    %141 = vector.shape_cast %140 : vector<1x1x128xf32> to vector<1x128xf32>
    %142 = vector.broadcast %141 : vector<1x128xf32> to vector<16x128xf32>
    %143 = arith.addf %139, %142 : vector<16x128xf32>
    %c0_48 = arith.constant 0 : index
    %c0_49 = arith.constant 0 : index
    %c0_50 = arith.constant 0 : index
    %144 = vector.load %arg11[%c0_48, %c0_49, %c0_50] : memref<1x1x128xf32, #tpu.memory_space<vmem>>, vector<1x1x128xf32>
    %145 = vector.shape_cast %144 : vector<1x1x128xf32> to vector<1x128xf32>
    %c0_51 = arith.constant 0 : index
    %c0_52 = arith.constant 0 : index
    %c0_53 = arith.constant 0 : index
    %146 = vector.load %arg12[%c0_51, %c0_52, %c0_53] : memref<1x1x128xf32, #tpu.memory_space<vmem>>, vector<1x1x128xf32>
    %147 = vector.shape_cast %146 : vector<1x1x128xf32> to vector<1x128xf32>
    %cst_54 = arith.constant dense<0.000000e+00> : vector<16xf32>
    %148 = vector.multi_reduction <add>, %143, %cst_54 [1] : vector<16x128xf32> to vector<16xf32>
    %149 = vector.shape_cast %148 : vector<16xf32> to vector<16x1xf32>
    %cst_55 = arith.constant 1.280000e+02 : f32
    %150 = vector.broadcast %cst_55 : f32 to vector<16x1xf32>
    %151 = arith.divf %149, %150 : vector<16x1xf32>
    %152 = arith.mulf %143, %143 : vector<16x128xf32>
    %cst_56 = arith.constant dense<0.000000e+00> : vector<16xf32>
    %153 = vector.multi_reduction <add>, %152, %cst_56 [1] : vector<16x128xf32> to vector<16xf32>
    %154 = vector.shape_cast %153 : vector<16xf32> to vector<16x1xf32>
    %cst_57 = arith.constant 1.280000e+02 : f32
    %155 = vector.broadcast %cst_57 : f32 to vector<16x1xf32>
    %156 = arith.divf %154, %155 : vector<16x1xf32>
    %157 = arith.mulf %151, %151 : vector<16x1xf32>
    %158 = arith.subf %156, %157 : vector<16x1xf32>
    %cst_58 = arith.constant 0.000000e+00 : f32
    %159 = vector.broadcast %cst_58 : f32 to vector<16x1xf32>
    %160 = arith.maximumf %158, %159 : vector<16x1xf32>
    %161 = vector.broadcast %151 : vector<16x1xf32> to vector<16x128xf32>
    %162 = arith.subf %143, %161 : vector<16x128xf32>
    %cst_59 = arith.constant 9.99999974E-6 : f32
    %163 = vector.broadcast %cst_59 : f32 to vector<16x1xf32>
    %164 = arith.addf %160, %163 : vector<16x1xf32>
    %165 = math.rsqrt %164 : vector<16x1xf32>
    %166 = vector.broadcast %165 : vector<16x1xf32> to vector<16x128xf32>
    %167 = arith.mulf %162, %166 : vector<16x128xf32>
    %168 = vector.broadcast %145 : vector<1x128xf32> to vector<16x128xf32>
    %169 = arith.mulf %167, %168 : vector<16x128xf32>
    %170 = vector.broadcast %147 : vector<1x128xf32> to vector<16x128xf32>
    %171 = arith.addf %169, %170 : vector<16x128xf32>
    %172 = arith.truncf %171 : vector<16x128xf32> to vector<16x128xbf16>
    %c0_60 = arith.constant 0 : index
    %c0_61 = arith.constant 0 : index
    %c0_62 = arith.constant 0 : index
    %173 = vector.load %arg13[%c0_60, %c0_61, %c0_62] : memref<1x128x256xbf16, #tpu.memory_space<vmem>>, vector<1x128x256xbf16>
    %174 = vector.shape_cast %173 : vector<1x128x256xbf16> to vector<128x256xbf16>
    %cst_63 = arith.constant dense<0.000000e+00> : vector<16x256xf32>
    %175 = tpu.matmul %172, %174, %cst_63 {dimension_numbers = #tpu.dot_dimension_numbers<[1], [0], [0], [1], [0, 0, 1, 1], [], []>} : vector<16x128xbf16>, vector<128x256xbf16>, vector<16x256xf32> -> vector<16x256xf32>
    %c0_64 = arith.constant 0 : index
    %c0_65 = arith.constant 0 : index
    %c0_66 = arith.constant 0 : index
    %176 = vector.load %arg14[%c0_64, %c0_65, %c0_66] : memref<1x1x256xf32, #tpu.memory_space<vmem>>, vector<1x1x256xf32>
    %177 = vector.shape_cast %176 : vector<1x1x256xf32> to vector<1x256xf32>
    %178 = vector.broadcast %177 : vector<1x256xf32> to vector<16x256xf32>
    %179 = arith.addf %175, %178 : vector<16x256xf32>
    %cst_67 = arith.constant 5.000000e-01 : f32
    %180 = vector.broadcast %cst_67 : f32 to vector<16x256xf32>
    %181 = arith.mulf %180, %179 : vector<16x256xf32>
    %cst_68 = arith.constant 4.471500e-02 : f32
    %182 = vector.broadcast %cst_68 : f32 to vector<16x256xf32>
    %183 = arith.mulf %182, %179 : vector<16x256xf32>
    %184 = arith.mulf %183, %179 : vector<16x256xf32>
    %185 = arith.mulf %184, %179 : vector<16x256xf32>
    %186 = arith.addf %179, %185 : vector<16x256xf32>
    %cst_69 = arith.constant 0.797884583 : f32
    %187 = vector.broadcast %cst_69 : f32 to vector<16x256xf32>
    %188 = arith.mulf %187, %186 : vector<16x256xf32>
    %189 = math.tanh %188 : vector<16x256xf32>
    %cst_70 = arith.constant 1.000000e+00 : f32
    %190 = vector.broadcast %cst_70 : f32 to vector<16x256xf32>
    %191 = arith.addf %190, %189 : vector<16x256xf32>
    %192 = arith.mulf %181, %191 : vector<16x256xf32>
    %193 = arith.truncf %192 : vector<16x256xf32> to vector<16x256xbf16>
    %c0_71 = arith.constant 0 : index
    %c0_72 = arith.constant 0 : index
    %c0_73 = arith.constant 0 : index
    %194 = vector.load %arg15[%c0_71, %c0_72, %c0_73] : memref<1x256x128xbf16, #tpu.memory_space<vmem>>, vector<1x256x128xbf16>
    %195 = vector.shape_cast %194 : vector<1x256x128xbf16> to vector<256x128xbf16>
    %cst_74 = arith.constant dense<0.000000e+00> : vector<16x128xf32>
    %196 = tpu.matmul %193, %195, %cst_74 {dimension_numbers = #tpu.dot_dimension_numbers<[1], [0], [0], [1], [0, 0, 1, 1], [], []>} : vector<16x256xbf16>, vector<256x128xbf16>, vector<16x128xf32> -> vector<16x128xf32>
    %c0_75 = arith.constant 0 : index
    %c0_76 = arith.constant 0 : index
    %c0_77 = arith.constant 0 : index
    %197 = vector.load %arg16[%c0_75, %c0_76, %c0_77] : memref<1x1x128xf32, #tpu.memory_space<vmem>>, vector<1x1x128xf32>
    %198 = vector.shape_cast %197 : vector<1x1x128xf32> to vector<1x128xf32>
    %199 = vector.broadcast %198 : vector<1x128xf32> to vector<16x128xf32>
    %200 = arith.addf %196, %199 : vector<16x128xf32>
    %201 = arith.addf %143, %200 : vector<16x128xf32>
    %c0_78 = arith.constant 0 : index
    %c0_79 = arith.constant 0 : index
    %202 = vector.load %arg21[%c0_78, %c0_79] : memref<16x128xf32, #tpu.memory_space<vmem>>, vector<16x128xf32>
    tpu.vector_store %arg21[%c0_78, %c0_79], %201 {strides = array<i32>} : memref<16x128xf32, #tpu.memory_space<vmem>>, vector<16x128xf32>,
    %c0_80 = arith.constant 0 : index
    %c0_81 = arith.constant 0 : index
    %c0_82 = arith.constant 0 : index
    %c0_83 = arith.constant 0 : index
    %203 = vector.load %arg19[%c0_80, %c0_81, %c0_82, %c0_83] : memref<1x1x16x128xf32, #tpu.memory_space<vmem>>, vector<1x1x16x128xf32>
    %204 = vector.shape_cast %203 : vector<1x1x16x128xf32> to vector<16x128xf32>
    %205 = vector.shape_cast %201 : vector<16x128xf32> to vector<1x1x16x128xf32>
    tpu.vector_store %arg19[%c0_80, %c0_81, %c0_82, %c0_83], %205 {strides = array<i32>} : memref<1x1x16x128xf32, #tpu.memory_space<vmem>>, vector<1x1x16x128xf32>,
    %c1_i32 = arith.constant 1 : i32
    %206 = arith.cmpi eq, %arg1, %c1_i32 : i32
    %207 = arith.extui %206 : i1 to i32
    %c0_i32_84 = arith.constant 0 : i32
    %208 = arith.cmpi ne, %207, %c0_i32_84 : i32
    scf.if %208 {
      %c0_85 = arith.constant 0 : index
      %c0_86 = arith.constant 0 : index
      %209 = vector.load %arg17[%c0_85, %c0_86] : memref<1x128xf32, #tpu.memory_space<vmem>>, vector<1x128xf32>
      %c0_87 = arith.constant 0 : index
      %c0_88 = arith.constant 0 : index
      %210 = vector.load %arg18[%c0_87, %c0_88] : memref<1x128xf32, #tpu.memory_space<vmem>>, vector<1x128xf32>
      %cst_89 = arith.constant dense<0.000000e+00> : vector<16xf32>
      %211 = vector.multi_reduction <add>, %201, %cst_89 [1] : vector<16x128xf32> to vector<16xf32>
      %212 = vector.shape_cast %211 : vector<16xf32> to vector<16x1xf32>
      %cst_90 = arith.constant 1.280000e+02 : f32
      %213 = vector.broadcast %cst_90 : f32 to vector<16x1xf32>
      %214 = arith.divf %212, %213 : vector<16x1xf32>
      %215 = arith.mulf %201, %201 : vector<16x128xf32>
      %cst_91 = arith.constant dense<0.000000e+00> : vector<16xf32>
      %216 = vector.multi_reduction <add>, %215, %cst_91 [1] : vector<16x128xf32> to vector<16xf32>
      %217 = vector.shape_cast %216 : vector<16xf32> to vector<16x1xf32>
      %cst_92 = arith.constant 1.280000e+02 : f32
      %218 = vector.broadcast %cst_92 : f32 to vector<16x1xf32>
      %219 = arith.divf %217, %218 : vector<16x1xf32>
      %220 = arith.mulf %214, %214 : vector<16x1xf32>
      %221 = arith.subf %219, %220 : vector<16x1xf32>
      %cst_93 = arith.constant 0.000000e+00 : f32
      %222 = vector.broadcast %cst_93 : f32 to vector<16x1xf32>
      %223 = arith.maximumf %221, %222 : vector<16x1xf32>
      %224 = vector.broadcast %214 : vector<16x1xf32> to vector<16x128xf32>
      %225 = arith.subf %201, %224 : vector<16x128xf32>
      %cst_94 = arith.constant 9.99999974E-6 : f32
      %226 = vector.broadcast %cst_94 : f32 to vector<16x1xf32>
      %227 = arith.addf %223, %226 : vector<16x1xf32>
      %228 = math.rsqrt %227 : vector<16x1xf32>
      %229 = vector.broadcast %228 : vector<16x1xf32> to vector<16x128xf32>
      %230 = arith.mulf %225, %229 : vector<16x128xf32>
      %231 = vector.broadcast %209 : vector<1x128xf32> to vector<16x128xf32>
      %232 = arith.mulf %230, %231 : vector<16x128xf32>
      %233 = vector.broadcast %210 : vector<1x128xf32> to vector<16x128xf32>
      %234 = arith.addf %232, %233 : vector<16x128xf32>
      %c0_95 = arith.constant 0 : index
      %c0_96 = arith.constant 0 : index
      %c0_97 = arith.constant 0 : index
      %235 = vector.load %arg20[%c0_95, %c0_96, %c0_97] : memref<1x16x128xf32, #tpu.memory_space<vmem>>, vector<1x16x128xf32>
      %236 = vector.shape_cast %235 : vector<1x16x128xf32> to vector<16x128xf32>
      %237 = vector.shape_cast %234 : vector<16x128xf32> to vector<1x16x128xf32>
      tpu.vector_store %arg20[%c0_95, %c0_96, %c0_97], %237 {strides = array<i32>} : memref<1x16x128xf32, #tpu.memory_space<vmem>>, vector<1x16x128xf32>,
    } else {
    }
    return
  }
  func.func @transform_0(%arg0: i32, %arg1: i32) -> (i32, i32, i32) {
    %c0_i32 = arith.constant 0 : i32
    %c0_i32_0 = arith.constant 0 : i32
    %c0_i32_1 = arith.constant 0 : i32
    return %arg0, %c0_i32, %c0_i32_0 : i32, i32, i32
  }
  func.func @transform_1(%arg0: i32, %arg1: i32) -> (i32, i32) {
    %c0_i32 = arith.constant 0 : i32
    %c0_i32_0 = arith.constant 0 : i32
    %c0_i32_1 = arith.constant 0 : i32
    return %c0_i32, %c0_i32_0 : i32, i32
  }
  func.func @transform_2(%arg0: i32, %arg1: i32) -> (i32, i32) {
    %c0_i32 = arith.constant 0 : i32
    %c0_i32_0 = arith.constant 0 : i32
    %c0_i32_1 = arith.constant 0 : i32
    return %c0_i32, %c0_i32_0 : i32, i32
  }
  func.func @transform_3(%arg0: i32, %arg1: i32) -> (i32, i32) {
    %c0_i32 = arith.constant 0 : i32
    %c0_i32_0 = arith.constant 0 : i32
    %c0_i32_1 = arith.constant 0 : i32
    return %c0_i32, %c0_i32_0 : i32, i32
  }
  func.func @transform_4(%arg0: i32, %arg1: i32) -> (i32, i32, i32) {
    %c0_i32 = arith.constant 0 : i32
    %c0_i32_0 = arith.constant 0 : i32
    %c0_i32_1 = arith.constant 0 : i32
    return %arg1, %c0_i32, %c0_i32_0 : i32, i32, i32
  }
  func.func @transform_5(%arg0: i32, %arg1: i32) -> (i32, i32, i32) {
    %c0_i32 = arith.constant 0 : i32
    %c0_i32_0 = arith.constant 0 : i32
    %c0_i32_1 = arith.constant 0 : i32
    return %arg1, %c0_i32, %c0_i32_0 : i32, i32, i32
  }
  func.func @transform_6(%arg0: i32, %arg1: i32) -> (i32, i32, i32) {
    %c0_i32 = arith.constant 0 : i32
    %c0_i32_0 = arith.constant 0 : i32
    %c0_i32_1 = arith.constant 0 : i32
    return %arg1, %c0_i32, %c0_i32_0 : i32, i32, i32
  }
  func.func @transform_7(%arg0: i32, %arg1: i32) -> (i32, i32, i32) {
    %c0_i32 = arith.constant 0 : i32
    %c0_i32_0 = arith.constant 0 : i32
    %c0_i32_1 = arith.constant 0 : i32
    return %arg1, %c0_i32, %c0_i32_0 : i32, i32, i32
  }
  func.func @transform_8(%arg0: i32, %arg1: i32) -> (i32, i32, i32) {
    %c0_i32 = arith.constant 0 : i32
    %c0_i32_0 = arith.constant 0 : i32
    %c0_i32_1 = arith.constant 0 : i32
    return %arg1, %c0_i32, %c0_i32_0 : i32, i32, i32
  }
  func.func @transform_9(%arg0: i32, %arg1: i32) -> (i32, i32, i32) {
    %c0_i32 = arith.constant 0 : i32
    %c0_i32_0 = arith.constant 0 : i32
    %c0_i32_1 = arith.constant 0 : i32
    return %arg1, %c0_i32, %c0_i32_0 : i32, i32, i32
  }
  func.func @transform_10(%arg0: i32, %arg1: i32) -> (i32, i32, i32) {
    %c0_i32 = arith.constant 0 : i32
    %c0_i32_0 = arith.constant 0 : i32
    %c0_i32_1 = arith.constant 0 : i32
    return %arg1, %c0_i32, %c0_i32_0 : i32, i32, i32
  }
  func.func @transform_11(%arg0: i32, %arg1: i32) -> (i32, i32, i32) {
    %c0_i32 = arith.constant 0 : i32
    %c0_i32_0 = arith.constant 0 : i32
    %c0_i32_1 = arith.constant 0 : i32
    return %arg1, %c0_i32, %c0_i32_0 : i32, i32, i32
  }
  func.func @transform_12(%arg0: i32, %arg1: i32) -> (i32, i32, i32) {
    %c0_i32 = arith.constant 0 : i32
    %c0_i32_0 = arith.constant 0 : i32
    %c0_i32_1 = arith.constant 0 : i32
    return %arg1, %c0_i32, %c0_i32_0 : i32, i32, i32
  }
  func.func @transform_13(%arg0: i32, %arg1: i32) -> (i32, i32, i32) {
    %c0_i32 = arith.constant 0 : i32
    %c0_i32_0 = arith.constant 0 : i32
    %c0_i32_1 = arith.constant 0 : i32
    return %arg1, %c0_i32, %c0_i32_0 : i32, i32, i32
  }
  func.func @transform_14(%arg0: i32, %arg1: i32) -> (i32, i32, i32) {
    %c0_i32 = arith.constant 0 : i32
    %c0_i32_0 = arith.constant 0 : i32
    %c0_i32_1 = arith.constant 0 : i32
    return %arg1, %c0_i32, %c0_i32_0 : i32, i32, i32
  }
  func.func @transform_15(%arg0: i32, %arg1: i32) -> (i32, i32) {
    %c0_i32 = arith.constant 0 : i32
    %c0_i32_0 = arith.constant 0 : i32
    %c0_i32_1 = arith.constant 0 : i32
    return %c0_i32, %c0_i32_0 : i32, i32
  }
  func.func @transform_16(%arg0: i32, %arg1: i32) -> (i32, i32) {
    %c0_i32 = arith.constant 0 : i32
    %c0_i32_0 = arith.constant 0 : i32
    %c0_i32_1 = arith.constant 0 : i32
    return %c0_i32, %c0_i32_0 : i32, i32
  }
  func.func @transform_17(%arg0: i32, %arg1: i32) -> (i32, i32, i32, i32) {
    %c0_i32 = arith.constant 0 : i32
    %c0_i32_0 = arith.constant 0 : i32
    %c0_i32_1 = arith.constant 0 : i32
    return %arg1, %arg0, %c0_i32, %c0_i32_0 : i32, i32, i32, i32
  }
  func.func @transform_18(%arg0: i32, %arg1: i32) -> (i32, i32, i32) {
    %c0_i32 = arith.constant 0 : i32
    %c0_i32_0 = arith.constant 0 : i32
    %c0_i32_1 = arith.constant 0 : i32
    return %arg0, %c0_i32, %c0_i32_0 : i32, i32, i32
  }
}

</mosaic_0001>

<bundles_post_ra>
// kernel: vit_forward.1
= control target key start
LH: loop header
LB: loop body
LE: loop exit
PB: predicated region body
PF: predicated region fallthrough
CT: control target
= control target key end

     0   :  { %s3431_s0 = inlined_call_operand.vmem [shape: f32[2,16,48], index: 0, kind: input, shape index: {}]   ;;  %s3432_s1 = inlined_call_operand.vmem [shape: bf16[48,128], index: 1, kind: input, shape index: {}]   ;;  %s3433_s2 = inlined_call_operand.vmem [shape: f32[1,128], index: 2, kind: input, shape index: {}]   ;;  %s3434_s3 = inlined_call_operand.vmem [shape: f32[16,128], index: 3, kind: input, shape index: {}]   ;;  %s3435_s4 = inlined_call_operand.vmem [shape: f32[2,1,128], index: 4, kind: input, shape index: {}]   ;;  %s3436_s5 = inlined_call_operand.vmem [shape: f32[2,1,128], index: 5, kind: input, shape index: {}]   ;;  %s3437_s6 = inlined_call_operand.vmem [shape: bf16[2,128,384], index: 6, kind: input, shape index: {}]   ;;  %s3438_s7 = inlined_call_operand.vmem [shape: bf16[2,128,128], index: 7, kind: input, shape index: {}]   ;;  %s3439_s8 = inlined_call_operand.vmem [shape: f32[2,1,128], index: 8, kind: input, shape index: {}]   ;;  %s3440_s9 = inlined_call_operand.vmem [shape: f32[2,1,128], index: 9, kind: input, shape index: {}]   ;;  %s3441_s10 = inlined_call_operand.vmem [shape: f32[2,1,128], index: 10, kind: input, shape index: {}]   ;;  %s3442_s11 = inlined_call_operand.vmem [shape: bf16[2,128,256], index: 11, kind: input, shape index: {}]   ;;  %s3443_s12 = inlined_call_operand.vmem [shape: f32[2,1,256], index: 12, kind: input, shape index: {}]   ;;  %s3444_s13 = inlined_call_operand.vmem [shape: bf16[2,256,128], index: 13, kind: input, shape index: {}]   ;;  %s3445_s14 = inlined_call_operand.vmem [shape: f32[2,1,128], index: 14, kind: input, shape index: {}]   ;;  %s3446_s15 = inlined_call_operand.vmem [shape: f32[1,128], index: 15, kind: input, shape index: {}]   ;;  %s3447_s16 = inlined_call_operand.vmem [shape: f32[1,128], index: 16, kind: input, shape index: {}]   ;;  %s3448_s17 = inlined_call_operand.vmem [shape: f32[2,2,16,128], index: 17, kind: output, shape index: {0}]   ;;  %s3449_s18 = inlined_call_operand.hbm [shape: f32[2,16,128], index: 18, kind: output, shape index: {1}]  }
   0x1   :  { %3467 = sst [smem:[#allocation19_spill]] %s3431_s0 }
   0x2   :  { %3468 = sst [smem:[#allocation20_spill]] %s3432_s1 }
   0x3   :  { %3469 = sst [smem:[#allocation21_spill]] %s3433_s2 }
   0x4   :  { %3470 = sst [smem:[#allocation22_spill]] %s3434_s3 }
   0x5   :  { %3471 = sst [smem:[#allocation23_spill]] %s3437_s6 }
   0x6   :  { %3472 = sst [smem:[#allocation24_spill]] %s3438_s7 }
   0x7   :  { %3473 = sst [smem:[#allocation25_spill]] %s3439_s8 }
   0x8   :  { %3474 = sst [smem:[#allocation26_spill]] %s3441_s10 }
   0x9   :  { %3475 = sst [smem:[#allocation27_spill]] %s3442_s11 }
   0xa   :  { %3476 = sst [smem:[#allocation28_spill]] %s3445_s14 }
   0xb   :  { %3477 = sst [smem:[#allocation29_spill]] %s3446_s15 }
   0xc   :  { %3478 = sst [smem:[#allocation30_spill]] %s3447_s16 }
   0xd   :  { %3479 = sst [smem:[#allocation31_spill]] %s3448_s17 }
   0xe   :  { %3480 = sst [smem:[#allocation32_spill]] %s3449_s18 }
   0xf   :  { %24 = vsyncpa [#allocation4], 0 }
  0x10   :  { %26 = vsyncpa [#allocation4 + $0x1], 0  ;;  %s2975_s27 = smov 0   ;;  %s2977_s28 = smov 0  }
  0x11   :  { %s2979_s29 = smov 0   ;;  %s2981_s30 = smov 0  }
  0x12   :  { %s2983_s0 = smov 0   ;;  %s2985_s19 = smov 0  }
  0x13   :  { %s2987_s1 = smov 0   ;;  %s2989_s20 = smov 0  }
  0x14 LB: > { %3481 = sst [smem:[#allocation6_spill]] %s2844_s27  ;;  %s2258_s21 = sadd.s32 4294967295, %s2872_s20   ;;  %s2872_s20 = sphi %s2989_s20, %s32_s20   ;;  %s2868_s1 = sphi %s2987_s1, %s3533_s1   ;;  %s2864_s19 = sphi %s2985_s19, %s3532_s19   ;;  %s2860_s0 = sphi %s2983_s0, %s3531_s0   ;;  %s2856_s30 = sphi %s2981_s30, %s3530_s30   ;;  %s2852_s29 = sphi %s2979_s29, %s3529_s29   ;;  %s2848_s28 = sphi %s2977_s28, %s3528_s28   ;;  %s2844_s27 = sphi %s2975_s27, %s3527_s27  }
  0x15   : > { %3482 = sst [smem:[#allocation7_spill]] %s2848_s28  ;;  %s2259_s22 = sadd.s32 4294967294, %s2872_s20  }
  0x16   : > { %3483 = sst [smem:[#allocation8_spill]] %s2852_s29  ;;  %s41_s2 = sadd.s32 1, %s2864_s19 }
  0x17   : > { %3484 = sst [smem:[#allocation9_spill]] %s2856_s30  ;;  %p42_p0 = scmp.ge.s32.totalorder %s41_s2, 2 }
  0x18   : > { %3485 = sst [smem:[#allocation10_spill]] %s2860_s0  ;;  %s44_s23 = sadd.s32 1, %s2868_s1 }
  0x19   : > { %3486 = sst [smem:[#allocation11_spill]] %s2864_s19  ;;  %p506_p1 = scmp.ne.s32.totalorder %s2852_s29, %s2848_s28 }
  0x1a   : > { %3487 = sst [smem:[#allocation12_spill]] %s2868_s1  ;;  %p507_p2 = scmp.eq.s32.totalorder %s2258_s21, 3 }
  0x1b   : > { %3488 = sst [smem:[#allocation13_spill]] %s2872_s20  ;;  %s3535_s2 = smov (%p42_p0, %s41_s2), 0 }
  0x1c   : > { %3489 = sst [smem:[#allocation14_spill]] %s3535_s2  ;;  %s3537_s23 = smov (!%p42_p0, %s44_s23), %s2868_s1 }
  0x1d   : > { %p3024_p3 = por %p507_p2, %p506_p1  ;;  %p512_p4 = scmp.ne.s32.totalorder %s2848_s28, %s2844_s27 }
  0x1e   : > { %p46_p5 = scmp.ge.s32.totalorder %s3537_s23, 2  ;;  %p513_p6 = scmp.eq.s32.totalorder %s2259_s22, 3 }
  0x1f   : > { %s3490_s24 = scalar_select %p3024_p3, 1, 0 }
  0x20   : > { %p2262_p7 = scmp.ge.s32.totalorder %s2872_s20, 1  ;;  %p629_p8 = scmp.lt.s32.totalorder %s2872_s20, 5 }
  0x21   : > { %3491 = sst [smem:[#allocation15_spill]] %s3490_s24  ;;  %s3539_s23 = smov (%p46_p5, %s3537_s23), 0 }
  0x22   : > { %3492 = sst [smem:[#allocation16_spill]] %s3539_s23  ;;  %p3034_p9 = por %p513_p6, %p512_p4 }
  0x23   : > { %p630_p10 = pnand %p2262_p7, %p629_p8  ;;  %s493_s26 = ssub.s32 %s2868_s1, %s3539_s23 }
  0x24   : > { %s3493_s25 = scalar_select %p3034_p9, 1, 0 }
  0x25   : > { %s496_s21 = sadd.s32 1, %s2852_s29  ;;  %p494_p11 = scmp.eq.s32.totalorder %s493_s26, 0 }
  0x26   : > { %3494 = sst [smem:[#allocation17_spill]] %s3493_s25  ;;  %633 = sbr.rel (%p630_p10) target bundleno = 2418 (0x972), region = 88 }
  0x27   : > { %s3042_s2 = scalar_select %p494_p11, %s2852_s29, %s496_s21  }
  0x28   : > { %s3456_s22 = sand.u32 (!%p630_p10), 1, %s2848_s28   ;;  %p734_p12 = scmp.lt.s32.totalorder (!%p630_p10), %s2860_s0, 1 }
  0x29   : > { %3495 = sst [smem:[#allocation18_spill]] %s3042_s2  ;;  %s2263_s19 = sshll.u32 (!%p630_p10), %s3456_s22, 4 }
  0x2a   : > { %p739_p13 = scmp.lt.s32.totalorder (!%p630_p10), %s2856_s30, 1  ;;  %s3496_s2 = sld [smem:[#allocation19_spill]] (!%p630_p10) }
  0x2b   : > { %s735_s27 = scalar_select %p734_p12, %s2860_s0, 1 }
  0x2c   : > { %s3051_s25 = scalar_select %p739_p13, %s2856_s30, 1 }
  0x2d   : > { %s2565_s26 = sshll.u32 %s735_s27, 4  ;;  %s2274_s21 = sshll.u32 %s735_s27, 1 }
  0x2e   : > { %s2637_s16 = smul.u32 192, %s3051_s25  ;;  %s2566_s15 = sshll.u32 %s3051_s25, 6 }
  0x2f   : > { %s3498_s6 = sld [smem:[#allocation23_spill]]  ;;  %s2567_s3 = sshll.u32 %s3051_s25, 7 }
  0x30   : > { %s738_s22 = scalar_lea.vmem %s3496_s2, %s2565_s26  ;;  %s3499_s7 = sld [smem:[#allocation24_spill]] }
  0x31   : > { %s2271_s30 = sshll.u32 %s3051_s25, 1  ;;  %s3501_s11 = sld [smem:[#allocation27_spill]] }
  0x32   : > { %s3103_s20 = scalar_lea.vmem %s3444_s13, %s2567_s3  ;;  %s3502_s24 = sld [smem:[#allocation28_spill]] }
  0x33   : > { %s2275_s28 = sshll.u32 %s3051_s25, 2 }
  0x35   : > { %s3073_s1 = scalar_lea.vmem %s3498_s6, %s2637_s16  ;;  %s787_s6 = sadd.s32 %s2275_s28, %s2274_s21 }
  0x36   : > { %s3078_s29 = scalar_lea.vmem %s3499_s7, %s2566_s15  ;;  %s3098_s15 = scalar_lea.vmem %s3443_s12, %s2271_s30 }
  0x37   : > { %s3093_s14 = scalar_lea.vmem %s3501_s11, %s2567_s3  ;;  %s2276_s7 = sshll.u32 %s787_s6, 3 }
  0x38   : > { %s780_s18 = scalar_lea.vmem %s3502_s24, %s3051_s25  ;;  %s3503_s11 = sld [smem:[#allocation31_spill]] }
  0x39   : > { %s3115_s16 = scalar_lea.vmem [#allocation3], %s2263_s19  ;;  %s3504_s30 = sld [smem:[#allocation9_spill]] }
  0x3e   : > { %s3113_s10 = scalar_lea.vmem %s3503_s11, %s2276_s7 }
  0x3f   : > { %p2277_p0 = scmp.ne.s32.totalorder %s3504_s30, 0 }
  0x40   : > { %s3505_s2 = sld [smem:[#allocation20_spill]] (!%p2277_p0) }
  0x41   : > { %794 = sbr.rel (%p2277_p0) target bundleno = 221 (0xdd), region = 92  ;;  %s3506_s19 = sld [smem:[#allocation21_spill]] (!%p2277_p0) }
  0x42   : > { %s3507_s24 = sld [smem:[#allocation22_spill]] (!%p2277_p0) }
  0x46   : > { %v2571_v0 = vld [vmem:[%s3505_s2 + $0x10] sm:$0xff]  ;;  %v2570_v1 = vld [vmem:[%s3505_s2 + $0x8] sm:$0xff]  ;;  %v2569_v2 = vld [vmem:[%s3505_s2] sm:$0xff]  ;;  %vm826_vm0 = vcmask 392192  }
  0x47   : > { %835 = vmatpush.bf16.msra.mxu0 %v2571_v0  ;;  %v795_v3 = vld [vmem:[%s738_s22] sm:$0xff]  ;;  %v796_v4 = vld [vmem:[%s738_s22 + $0x8] sm:$0xff] }
  0x48   : > { %v797_v5 = vpack.c.bf16 %v796_v4, %v795_v3  ;;  %v2715_v6 = vld [vmem:[%s3506_s19] ss:$0 sm:$0xff]  ;;  %v845_v12 = vld [vmem:[%s3507_s24 + $0x8] sm:$0xff] }
  0x49   : > { %v844_v8 = vld [vmem:[%s3507_s24] sm:$0xff] }
  0x4b   : > { %836 = vmatpush.bf16.msra.mxu0 %v2570_v1 }
  0x4f   : > { %837 = vmatpush.bf16.msra.mxu0 %v2569_v2 }
  0x52   : > { %2290 = vmatmul.msk.bf16.vlgmr.msra.gmra.mxu0 %vm826_vm0, %v797_v5 }
  0xcf   : > { %v839_v7 = vpop.f32.mrf.mxu0 }
  0xd0   : > { %v840_v9 = vadd.f32 %v2715_v6, %v839_v7 }
  0xd2   : > { %v846_v10 = vadd.f32 %v844_v8, %v840_v9 }
  0xd4   : > { %848 = vst [vmem:[#allocation2] sm:$0xff] %v846_v10 }
  0xd7   : > { %v841_v11 = vpop.f32.mrf.mxu0 }
  0xd8   : > { %v842_v13 = vadd.f32 %v2715_v6, %v841_v11 }
  0xda   : > { %v847_v14 = vadd.f32 %v845_v12, %v842_v13 }
  0xdc   : > { %849 = vst [vmem:[#allocation2 + $0x8] sm:$0xff] %v847_v14 }
  0xdd PF: > { %v3136_v15 = vld [vmem:[#allocation2] sm:$0xff]  ;;  %v2874_v19 = vmov 128.0   ;;  %v2377_v21 = vld [vmem:[%s3073_s1 + $0xa8] sm:$0xf]  ;;  %v2594_v22 = vld [vmem:[%s3073_s1 + $0xb0] sm:$0xf0]  ;;  %s3508_s30 = scalar_lea.vmem %s3435_s4, %s3051_s25  ;;  %s3509_s23 = scalar_lea.vmem %s3436_s5, %s3051_s25 }
  0xde   : > { %854 = vadd.xlane.f32.xlu0 %v3136_v15  ;;  %v867_v16 = vmul.f32 %v3136_v15, %v3136_v15  ;;  %2722 = vrcp.f32 %v2874_v19  ;;  %v2593_v23 = vld [vmem:[%s3073_s1 + $0xac] sm:$0xf]  ;;  %v2378_v24 = vor.u32 %v2594_v22, %v2377_v21  ;;  %v2379_v25 = vld [vmem:[%s3073_s1 + $0xb4] sm:$0xf0]  ;;  %v2385_v26 = vld [vmem:[%s3073_s1 + $0xb0] sm:$0xf]  ;;  %s3512_s0 = scalar_lea.vmem %s3440_s9, %s3051_s25 }
  0xdf   : > { %v2595_v27 = vld [vmem:[%s3073_s1 + $0xb8] sm:$0xf0]  ;;  %v2382_v29 = vor.u32 %v2593_v23, %v2379_v25  ;;  %v2365_v31 = vld [vmem:[%s3073_s1 + $0x90] sm:$0xf]  ;;  %v2590_v33 = vld [vmem:[%s3073_s1 + $0x94] sm:$0xf] }
  0xe0   : > { %869 = vadd.xlane.f32.xlu1 %v867_v16  ;;  %v2386_v30 = vor.u32 %v2595_v27, %v2385_v26  ;;  %1078 = vmatpush.bf16.msra.mxu0 %v2378_v24  ;;  %v2591_v32 = vld [vmem:[%s3073_s1 + $0x98] sm:$0xf0]  ;;  %v2367_v35 = vld [vmem:[%s3073_s1 + $0x9c] sm:$0xf0]  ;;  %v2373_v36 = vld [vmem:[%s3073_s1 + $0x98] sm:$0xf] }
  0xe1   : > { %1092 = vmatpush.bf16.msra.mxu1 %v2382_v29  ;;  %v2366_v34 = vor.u32 %v2591_v32, %v2365_v31  ;;  %v2592_v37 = vld [vmem:[%s3073_s1 + $0xa0] sm:$0xf0]  ;;  %v2370_v39 = vor.u32 %v2590_v33, %v2367_v35  ;;  %v2353_v41 = vld [vmem:[%s3073_s1 + $0x78] sm:$0xf]  ;;  %v2587_v43 = vld [vmem:[%s3073_s1 + $0x7c] sm:$0xf] }
  0xe2   : > { %1106 = vmatpush.bf16.msra.mxu2 %v2386_v30  ;;  %v2374_v40 = vor.u32 %v2592_v37, %v2373_v36  ;;  %v2588_v42 = vld [vmem:[%s3073_s1 + $0x80] sm:$0xf0]  ;;  %v2355_v45 = vld [vmem:[%s3073_s1 + $0x84] sm:$0xf0]  ;;  %v2361_v46 = vld [vmem:[%s3073_s1 + $0x80] sm:$0xf] }
  0xe3   : > { %v3141_v17 = vld [vmem:[#allocation2 + $0x8] sm:$0xff]  ;;  %v2354_v44 = vor.u32 %v2588_v42, %v2353_v41  ;;  %v2358_v49 = vor.u32 %v2587_v43, %v2355_v45  ;;  %v2341_v51 = vld [vmem:[%s3073_s1 + $0x60] sm:$0xf]  ;;  %v2584_v53 = vld [vmem:[%s3073_s1 + $0x64] sm:$0xf]  ;;  %vm1138_vm8 = vcmask 261120  }
  0xe4   : > { %v868_v18 = vmul.f32 %v3141_v17, %v3141_v17  ;;  %v2723_v20 = vpop.eup %2722  ;;  %1079 = vmatpush.bf16.msra.mxu0 %v2366_v34  ;;  %v2589_v47 = vld [vmem:[%s3073_s1 + $0x88] sm:$0xf0]  ;;  %v2343_v55 = vld [vmem:[%s3073_s1 + $0x6c] sm:$0xf0]  ;;  %v2349_v56 = vld [vmem:[%s3073_s1 + $0x68] sm:$0xf] }
  0xe5   : > { %v859_v28 = vmul.f32 128.0, %v2723_v20  ;;  %1093 = vmatpush.bf16.msra.mxu1 %v2370_v39  ;;  %v2362_v50 = vor.u32 %v2589_v47, %v2361_v46  ;;  %v2585_v52 = vld [vmem:[%s3073_s1 + $0x68] sm:$0xf0]  ;;  %v2586_v57 = vld [vmem:[%s3073_s1 + $0x70] sm:$0xf0]  ;;  %v2346_v59 = vor.u32 %v2584_v53, %v2343_v55  ;;  %vm863_vm1 = vweird.f32 %v2723_v20  ;;  %s2875_s26 = smov 96  }
  0xe6   : > { %856 = vadd.xlane.f32.xlu0 %v3141_v17  ;;  %1107 = vmatpush.bf16.msra.mxu2 %v2374_v40  ;;  %v2342_v54 = vor.u32 %v2585_v52, %v2341_v51  ;;  %v2350_v60 = vor.u32 %v2586_v57, %v2349_v56  ;;  %v2329_v61 = vld [vmem:[%s3073_s1 + $0x48] sm:$0xf]  ;;  %v2582_v62 = vld [vmem:[%s3073_s1 + $0x50] sm:$0xf0]  ;;  %v2581_v63 = vld [vmem:[%s3073_s1 + $0x4c] sm:$0xf] }
  0xe7   : > { %v860_v38 = vsub.f32 1.0, %v859_v28  ;;  %v2330_v0 = vor.u32 %v2582_v62, %v2329_v61  ;;  %v2331_v1 = vld [vmem:[%s3073_s1 + $0x54] sm:$0xf0]  ;;  %v2337_v2 = vld [vmem:[%s3073_s1 + $0x50] sm:$0xf]  ;;  %vm1161_vm9 = vcmask 130048  }
  0xe8   : > { %871 = vadd.xlane.f32.xlu1 %v868_v18  ;;  %1080 = vmatpush.bf16.msra.mxu0 %v2354_v44  ;;  %v2583_v3 = vld [vmem:[%s3073_s1 + $0x58] sm:$0xf0]  ;;  %v2334_v5 = vor.u32 %v2581_v63, %v2331_v1  ;;  %v2317_v8 = vld [vmem:[%s3073_s1 + $0x30] sm:$0xf]  ;;  %v2578_v10 = vld [vmem:[%s3073_s1 + $0x34] sm:$0xf] }
  0xe9   : > { %v861_v48 = vmul.f32 %v2723_v20, %v860_v38  ;;  %1094 = vmatpush.bf16.msra.mxu1 %v2358_v49  ;;  %v2338_v6 = vor.u32 %v2583_v3, %v2337_v2  ;;  %v2579_v9 = vld [vmem:[%s3073_s1 + $0x38] sm:$0xf0]  ;;  %v2319_v13 = vld [vmem:[%s3073_s1 + $0x3c] sm:$0xf0]  ;;  %v2325_v14 = vld [vmem:[%s3073_s1 + $0x38] sm:$0xf] }
  0xea   : > { %1108 = vmatpush.bf16.msra.mxu2 %v2362_v50  ;;  %v2318_v12 = vor.u32 %v2579_v9, %v2317_v8  ;;  %v2580_v16 = vld [vmem:[%s3073_s1 + $0x40] sm:$0xf0]  ;;  %v2322_v19 = vor.u32 %v2578_v10, %v2319_v13  ;;  %v2305_v23 = vld [vmem:[%s3073_s1 + $0x18] sm:$0xf]  ;;  %v2575_v25 = vld [vmem:[%s3073_s1 + $0x1c] sm:$0xf] }
  0xeb   : > { %v862_v58 = vadd.f32 %v2723_v20, %v861_v48  ;;  %v2576_v24 = vld [vmem:[%s3073_s1 + $0x20] sm:$0xf0]  ;;  %v2307_v27 = vld [vmem:[%s3073_s1 + $0x24] sm:$0xf0]  ;;  %v2313_v28 = vld [vmem:[%s3073_s1 + $0x20] sm:$0xf] }
  0xec   : > { %1081 = vmatpush.bf16.msra.mxu0 %v2342_v54  ;;  %v2306_v26 = vor.u32 %v2576_v24, %v2305_v23  ;;  %v2577_v29 = vld [vmem:[%s3073_s1 + $0x28] sm:$0xf0]  ;;  %v2310_v31 = vor.u32 %v2575_v25, %v2307_v27  ;;  %v2293_v33 = vld [vmem:[%s3073_s1] sm:$0xf]  ;;  %v2572_v35 = vld [vmem:[%s3073_s1 + $0x4] sm:$0xf] }
  0xed   : > { %1095 = vmatpush.bf16.msra.mxu1 %v2346_v59  ;;  %v3176_v4 = vsel %vm863_vm1, %v2723_v20, %v862_v58  ;;  %v2326_v20 = vor.u32 %v2580_v16, %v2325_v14  ;;  %v2314_v32 = vor.u32 %v2577_v29, %v2313_v28  ;;  %v2573_v34 = vld [vmem:[%s3073_s1 + $0x8] sm:$0xf0]  ;;  %v2295_v36 = vld [vmem:[%s3073_s1 + $0xc] sm:$0xf0]  ;;  %v2301_v37 = vld [vmem:[%s3073_s1 + $0x8] sm:$0xf] }
  0xee   : > { %1109 = vmatpush.bf16.msra.mxu2 %v2350_v60  ;;  %v2574_v38 = vld [vmem:[%s3073_s1 + $0x10] sm:$0xf0]  ;;  %v2294_v40 = vor.u32 %v2573_v34, %v2293_v33  ;;  %v2298_v42 = vor.u32 %v2572_v35, %v2295_v36  ;;  %v2716_v2 = vld [vmem:[%s3508_s30] ss:$0 sm:$0xff]  ;;  %s2876_s6 = smov 64   ;;  %s2877_s21 = smov 32  }
  0xef   : > { %v2302_v43 = vor.u32 %v2574_v38, %v2301_v37  ;;  %v2717_v9 = vld [vmem:[%s3509_s23] ss:$0 sm:$0xff]  ;;  %s3510_s11 = sld [smem:[#allocation25_spill]] }
  0xf0   : > { %1082 = vmatpush.bf16.msra.mxu0 %v2330_v0  ;;  %s3513_s22 = sld [smem:[#allocation26_spill]] }
  0xf1   : > { %1096 = vmatpush.bf16.msra.mxu1 %v2334_v5  ;;  %s3516_s17 = sld [smem:[#allocation9_spill]] }
  0xf2   : > { %1110 = vmatpush.bf16.msra.mxu2 %v2338_v6 }
  0xf4   : > { %1083 = vmatpush.bf16.msra.mxu0 %v2318_v12 }
  0xf5   : > { %1097 = vmatpush.bf16.msra.mxu1 %v2322_v19  ;;  %s3511_s19 = scalar_lea.vmem %s3510_s11, %s3051_s25 }
  0xf6   : > { %1111 = vmatpush.bf16.msra.mxu2 %v2326_v20  ;;  %s3514_s1 = scalar_lea.vmem %s3513_s22, %s3051_s25 }
  0xf7   : > { %p2559_p1 = scmp.ne.s32.totalorder %s3516_s17, 1 }
  0xf8   : > { %1084 = vmatpush.bf16.msra.mxu0 %v2306_v26  ;;  %s3517_s25 = sld [smem:[#allocation29_spill]] (!%p2559_p1) }
  0xf9   : > { %1098 = vmatpush.bf16.msra.mxu1 %v2310_v31 }
  0xfa   : > { %1112 = vmatpush.bf16.msra.mxu2 %v2314_v32 }
  0xfc   : > { %1085 = vmatpush.bf16.msra.mxu0 %v2294_v40 }
  0xfd   : > { %1099 = vmatpush.bf16.msra.mxu1 %v2298_v42 }
  0xfe   : > { %1113 = vmatpush.bf16.msra.mxu2 %v2302_v43 }
 0x151   : > { %v855_v7 = vpop.xlane.xlu0 %854 }
 0x152   : > { %v3182_v11 = vmul.f32 %v3176_v4, %v855_v7 }
 0x153   : > { %v870_v18 = vpop.xlane.xlu1 %869 }
 0x154   : > { %v875_v21 = vmul.f32 %v3182_v11, %v3182_v11  ;;  %v873_v22 = vmul.f32 %v870_v18, %v3176_v4  ;;  %v881_v63 = vsub.f32 %v3136_v15, %v3182_v11 }
 0x156   : > { %v877_v30 = vsub.f32 %v873_v22, %v875_v21 }
 0x158   : > { %v879_v39 = vmax.f32 %v877_v30, 0.0 }
 0x159   : > { %v857_v41 = vpop.xlane.xlu0 %856 }
 0x15a   : > { %v883_v44 = vadd.f32 1e-05, %v879_v39  ;;  %v866_v45 = vmul.f32 %v3176_v4, %v857_v41 }
 0x15b   : > { %v872_v46 = vpop.xlane.xlu1 %871 }
 0x15c   : > { %2724 = vrsqrt.f32 %v883_v44  ;;  %v876_v47 = vmul.f32 %v866_v45, %v866_v45  ;;  %v874_v48 = vmul.f32 %v872_v46, %v3176_v4  ;;  %vm891_vm3 = vweird.f32 %v883_v44 }
 0x15d   : > { %v882_v5 = vsub.f32 %v3141_v17, %v866_v45  ;;  %v2596_v45 = vld [vmem:[%s3078_s29] sm:$0xff] }
 0x15e   : > { %v878_v49 = vsub.f32 %v874_v48, %v876_v47 }
 0x160   : > { %v880_v50 = vmax.f32 %v878_v49, 0.0 }
 0x162   : > { %v2725_v51 = vpop.eup %2724  ;;  %v884_v53 = vadd.f32 1e-05, %v880_v50 }
 0x163   : > { %v886_v52 = vmul.f32 %v2725_v51, %v883_v44  ;;  %vm892_vm2 = vweird.f32 %v2725_v51  ;;  %v2597_v44 = vld [vmem:[%s3078_s29 + $0x8] sm:$0xff] }
 0x164   : > { %2726 = vrsqrt.f32 %v884_v53  ;;  %vm893_vm4 = vmor %vm891_vm3, %vm892_vm2  ;;  %vm901_vm6 = vweird.f32 %v884_v53  ;;  %1327 = vmatpush.bf16.msrb.mxu2 %v2597_v44 }
 0x165   : > { %v887_v54 = vmul.f32 %v2725_v51, %v886_v52 }
 0x167   : > { %v888_v55 = vmul.f32 0.5, %v887_v54 }
 0x168   : > { %1328 = vmatpush.bf16.msrb.mxu2 %v2596_v45 }
 0x169   : > { %v889_v56 = vsub.f32 1.5, %v888_v55 }
 0x16a   : > { %v2727_v57 = vpop.eup %2726 }
 0x16b   : > { %v890_v58 = vmul.f32 %v2725_v51, %v889_v56  ;;  %v896_v59 = vmul.f32 %v2727_v57, %v884_v53  ;;  %vm902_vm5 = vweird.f32 %v2727_v57 }
 0x16c   : > { %vm903_vm7 = vmor %vm901_vm6, %vm902_vm5 }
 0x16d   : > { %v897_v60 = vmul.f32 %v2727_v57, %v896_v59  ;;  %v894_v62 = vsel %vm893_vm4, %v2725_v51, %v890_v58 }
 0x16e   : > { %v905_v1 = vmul.f32 %v894_v62, %v881_v63 }
 0x16f   : > { %v898_v61 = vmul.f32 0.5, %v897_v60 }
 0x170   : > { %v910_v8 = vmul.f32 %v2716_v2, %v905_v1 }
 0x171   : > { %v899_v0 = vsub.f32 1.5, %v898_v61 }
 0x172   : > { %v915_v11 = vadd.f32 %v2717_v9, %v910_v8 }
 0x173   : > { %v900_v3 = vmul.f32 %v2727_v57, %v899_v0 }
 0x175   : > { %v904_v6 = vsel %vm903_vm7, %v2727_v57, %v900_v3 }
 0x176   : > { %v906_v7 = vmul.f32 %v904_v6, %v882_v5 }
 0x178   : > { %v911_v10 = vmul.f32 %v2716_v2, %v906_v7 }
 0x17a   : > { %v916_v12 = vadd.f32 %v2717_v9, %v911_v10 }
 0x17c   : > { %v917_v13 = vpack.c.bf16 %v916_v12, %v915_v11 }
 0x17e   : > { %1086 = vmatmul.bf16.vlgmr.msra.gmra.mxu0 %v917_v13  ;;  %1100 = vmatmul.bf16.vlgmr.msra.gmra.mxu1 %v917_v13 }
 0x17f   : > { %1114 = vmatmul.bf16.vlgmr.msra.gmra.mxu2 %v917_v13 }
 0x1fb   : > { %v1101_v14 = vpop.f32.mrf.mxu1  ;;  %v1087_v16 = vpop.f32.mrf.mxu0 }
 0x202   : > { %v1115_v18 = vpop.f32.mrf.mxu2 }
 0x203   : > { %v1103_v19 = vpop.f32.mrf.mxu1  ;;  %v1089_v22 = vpop.f32.mrf.mxu0 }
 0x204   : > { %v1137_v20 = vpack.c.bf16 %v1103_v19, %v1101_v14  ;;  %v1136_v25 = vpack.c.bf16 %v1089_v22, %v1087_v16 }
 0x206   : > { %v1143_v21 = vsel %vm1138_vm8, %v1137_v20, 0 }
 0x207   : > { %1152 = vmatpush.bf16.xpose.msra.mxu3 %v1143_v21 }
 0x20a   : > { %v1117_v23 = vpop.f32.mrf.mxu2 }
 0x20b   : > { %v3218_v24 = vpack.c.bf16 %v1117_v23, %v1115_v18 }
 0x20e   : > { %2387 = vmatmul.msk.bf16.vlgmr.msra.gmra.mxu3 %vm1138_vm8, %v1136_v25 }
 0x20f   : > { %1196 = vmatpush.bf16.msrb.mxu3 %v3218_v24 }
 0x291   : > { %v1154_v26 = vpop.f32.mrf.mxu3 }
 0x292   : > { %v1159_v27 = vmul.f32 0.17677669, %v1154_v26 }
 0x294   : > { %v1162_v28 = vsel %vm1161_vm9, %v1159_v27, -inf }
 0x295   : > { %1163 = vmax.xlane.f32.xlu2 %v1162_v28 }
 0x299   : > { %v1156_v29 = vpop.f32.mrf.mxu3 }
 0x29a   : > { %v1160_v30 = vmul.f32 0.17677669, %v1156_v29 }
 0x29c   : > { %v1165_v31 = vsel %vm1161_vm9, %v1160_v30, -inf }
 0x29d   : > { %1166 = vmax.xlane.f32.xlu2 %v1165_v31 }
 0x2b5   : > { %1208 = vrot.lane.b32.xlu2 %v1137_v20, %s2875_s26 }
 0x2bd   : > { %1337 = vrot.lane.b32.xlu2 %v1137_v20, %s2876_s6 }
 0x2c5   : > { %1335 = vrot.lane.b32.xlu2 %v1136_v25, %s2876_s6 }
 0x308   : > { %v1164_v32 = vpop.xlane.xlu2 %1163 }
 0x309   : > { %v1168_v33 = vsub.f32 %v1159_v27, %v1164_v32 }
 0x30b   : > { %v1170_v34 = vmul.f32 1.442695, %v1168_v33 }
 0x30d   : > { %2728 = vpow2.f32 %v1170_v34 }
 0x310   : > { %v1167_v35 = vpop.xlane.xlu2 %1166 }
 0x311   : > { %v1169_v36 = vsub.f32 %v1160_v30, %v1167_v35 }
 0x313   : > { %v2729_v37 = vpop.eup %2728  ;;  %v1172_v38 = vmul.f32 1.442695, %v1169_v36 }
 0x314   : > { %v1174_v39 = vsel %vm1161_vm9, %v2729_v37, 0.0 }
 0x315   : > { %2730 = vpow2.f32 %v1172_v38  ;;  %1175 = vadd.xlane.f32.xlu0 %v1174_v39 }
 0x318   : > { %v1209_v40 = vpop.permute.xlu2 %1208 }
 0x319   : > { %v1214_v41 = vsel %vm1138_vm8, %v1209_v40, 0 }
 0x31a   : > { %1223 = vmatpush.bf16.xpose.msra.mxu3 %v1214_v41 }
 0x31b   : > { %v2731_v42 = vpop.eup %2730 }
 0x31c   : > { %v1177_v43 = vsel %vm1161_vm9, %v2731_v42, 0.0 }
 0x31d   : > { %1178 = vadd.xlane.f32.xlu1 %v1177_v43 }
 0x320   : > { %v1338_v52 = vpop.permute.xlu2 %1337 }
 0x321   : > { %v1343_v54 = vsel %vm1138_vm8, %v1338_v52, 0 }
 0x328   : > { %v1336_v58 = vpop.permute.xlu2 %1335 }
 0x329   : > { %1205 = vrot.lane.b32.xlu0 %v1136_v25, %s2875_s26 }
 0x331   : > { %1436 = vrot.lane.b32.xlu0 %v1136_v25, %s2877_s21 }
 0x336   : > { %1438 = vrot.lane.b32.xlu1 %v1137_v20, %s2877_s21 }
 0x388   : > { %v1176_v46 = vpop.xlane.xlu0 %1175 }
 0x389   : > { %2732 = vrcp.f32 %v1176_v46 }
 0x38f   : > { %v2733_v48 = vpop.eup %2732 }
 0x390   : > { %v1179_v47 = vpop.xlane.xlu1 %1178  ;;  %v1182_v50 = vmul.f32 %v2733_v48, %v2729_v37 }
 0x391   : > { %2734 = vrcp.f32 %v1179_v47 }
 0x397   : > { %v2735_v49 = vpop.eup %2734 }
 0x398   : > { %v1183_v51 = vmul.f32 %v2735_v49, %v2731_v42 }
 0x39a   : > { %v1184_v53 = vpack.c.bf16 %v1183_v51, %v1182_v50 }
 0x39b   : > { %v1206_v57 = vpop.permute.xlu0 %1205 }
 0x39c   : > { %2388 = vmatmul.msk.bf16.vlgmr.msrb.gmra.mxu3 %vm1161_vm9, %v1184_v53 }
 0x39d   : > { %1352 = vmatpush.bf16.xpose.msrb.mxu3 %v1343_v54 }
 0x3a3   : > { %v1437_v3 = vpop.permute.xlu0 %1436 }
 0x3a8   : > { %v1439_v55 = vpop.permute.xlu1 %1438 }
 0x3a9   : > { %v1444_v56 = vsel %vm1138_vm8, %v1439_v55, 0 }
 0x3aa   : > { %1453 = vmatpush.bf16.xpose.msra.mxu2 %v1444_v56 }
 0x3ac   : > { %2389 = vmatmul.msk.bf16.vlgmr.msra.gmra.mxu3 %vm1138_vm8, %v1206_v57 }
 0x3bc   : > { %2409 = vmatmul.msk.bf16.vlgmr.msrb.gmra.mxu3 %vm1138_vm8, %v1336_v58 }
 0x41f   : > { %v1198_v59 = vpop.f32.mrf.mxu3 }
 0x427   : > { %v1200_v60 = vpop.f32.mrf.mxu3 }
 0x428   : > { %v1203_v61 = vpack.c.bf16 %v1200_v60, %v1198_v59 }
 0x42a   : > { %2408 = vmatmul.msk.bf16.vlgmr.msrb.gmra.mxu2 %vm1138_vm8, %v1203_v61  ;;  %v2599_v61 = vld [vmem:[%s3078_s29 + $0x18] sm:$0xff] }
 0x42b   : > { %1298 = vmatpush.bf16.msrb.mxu1 %v2599_v61  ;;  %v2615_v61 = vld [vmem:[%s3093_s14 + $0x54] sm:$0xf0] }
 0x42f   : > { %v1225_v62 = vpop.f32.mrf.mxu3 }
 0x430   : > { %v1230_v63 = vmul.f32 0.17677669, %v1225_v62  ;;  %v2598_v62 = vld [vmem:[%s3078_s29 + $0x10] sm:$0xff] }
 0x431   : > { %1299 = vmatpush.bf16.msrb.mxu1 %v2598_v62  ;;  %v2614_v62 = vld [vmem:[%s3093_s14 + $0x54] sm:$0xf] }
 0x432   : > { %v1232_v0 = vsel %vm1161_vm9, %v1230_v63, -inf }
 0x433   : > { %1233 = vmax.xlane.f32.xlu1 %v1232_v0 }
 0x437   : > { %v1227_v1 = vpop.f32.mrf.mxu3 }
 0x438   : > { %v1231_v2 = vmul.f32 0.17677669, %v1227_v1 }
 0x43a   : > { %2420 = vmatmul.msk.bf16.vlgmr.msra.gmra.mxu2 %vm1138_vm8, %v1437_v3  ;;  %v1235_v5 = vsel %vm1161_vm9, %v1231_v2, -inf }
 0x43b   : > { %1236 = vmax.xlane.f32.xlu0 %v1235_v5 }
 0x43f   : > { %v1354_v6 = vpop.f32.mrf.mxu3 }
 0x440   : > { %v1359_v7 = vmul.f32 0.17677669, %v1354_v6 }
 0x442   : > { %v1361_v8 = vsel %vm1161_vm9, %v1359_v7, -inf }
 0x443   : > { %1362 = vmax.xlane.f32.xlu0 %v1361_v8 }
 0x447   : > { %v1356_v23 = vpop.f32.mrf.mxu3 }
 0x448   : > { %v1360_v26 = vmul.f32 0.17677669, %v1356_v23  ;;  %v2602_v23 = vld [vmem:[%s3078_s29 + $0x30] sm:$0xff] }
 0x44a   : > { %v1364_v32 = vsel %vm1161_vm9, %v1360_v26, -inf }
 0x4a6   : > { %v1234_v18 = vpop.xlane.xlu1 %1233 }
 0x4a7   : > { %v1238_v21 = vsub.f32 %v1230_v63, %v1234_v18 }
 0x4a9   : > { %v1240_v25 = vmul.f32 1.442695, %v1238_v21 }
 0x4ad   : > { %v3245_v9 = vpop.f32.mrf.mxu2 }
 0x4ae   : > { %v1237_v10 = vpop.xlane.xlu0 %1236 }
 0x4af   : > { %v1239_v11 = vsub.f32 %v1231_v2, %v1237_v10 }
 0x4b1   : > { %v1242_v12 = vmul.f32 1.442695, %v1239_v11 }
 0x4b3   : > { %2736 = vpow2.f32 %v1242_v12 }
 0x4b4   : > { %2738 = vpow2.f32 %v1240_v25  ;;  %v2601_v25 = vld [vmem:[%s3078_s29 + $0x28] sm:$0xff] }
 0x4b5   : > { %v3247_v13 = vpop.f32.mrf.mxu2  ;;  %1426 = vmatpush.bf16.msra.mxu1 %v2601_v25  ;;  %v2451_v25 = vld [vmem:[%s3093_s14 + $0x28] sm:$0xf0] }
 0x4b6   : > { %v1363_v27 = vpop.xlane.xlu0 %1362 }
 0x4b7   : > { %v1367_v30 = vsub.f32 %v1359_v7, %v1363_v27 }
 0x4b9   : > { %v2737_v14 = vpop.eup %2736  ;;  %v1369_v33 = vmul.f32 1.442695, %v1367_v30 }
 0x4ba   : > { %v1247_v16 = vsel %vm1161_vm9, %v2737_v14, 0.0  ;;  %v2739_v34 = vpop.eup %2738 }
 0x4bb   : > { %1248 = vadd.xlane.f32.xlu0 %v1247_v16  ;;  %2740 = vpow2.f32 %v1369_v33  ;;  %v1244_v35 = vsel %vm1161_vm9, %v2739_v34, 0.0 }
 0x4bd   : > { %v1455_v19 = vpop.f32.mrf.mxu2 }
 0x4be   : > { %v1460_v20 = vmul.f32 0.17677669, %v1455_v19 }
 0x4c0   : > { %v1462_v22 = vsel %vm1161_vm9, %v1460_v20, -inf }
 0x4c1   : > { %1463 = vmax.xlane.f32.xlu2 %v1462_v22  ;;  %v3254_v36 = vpop.eup %2740  ;;  %v2603_v22 = vld [vmem:[%s3078_s29 + $0x38] sm:$0xff] }
 0x4c2   : > { %v1373_v37 = vsel %vm1161_vm9, %v3254_v36, 0.0 }
 0x4c5   : > { %v1457_v28 = vpop.f32.mrf.mxu2 }
 0x4c6   : > { %v1461_v29 = vmul.f32 0.17677669, %v1457_v28 }
 0x4c8   : > { %v1465_v31 = vsel %vm1161_vm9, %v1461_v29, -inf }
 0x4c9   : > { %1466 = vmax.xlane.f32.xlu1 %v1465_v31  ;;  %1365 = vmax.xlane.f32.xlu2 %v1364_v32 }
 0x4d1   : > { %1245 = vadd.xlane.f32.xlu1 %v1244_v35 }
 0x4d9   : > { %1374 = vadd.xlane.f32.xlu1 %v1373_v37 }
 0x4e1   : > { %1256 = vrot.lane.b32.xlu2 %v3218_v24, %s2875_s26  ;;  %s3518_s26 = sld [smem:[#allocation30_spill]] (!%p2559_p1) }
 0x52e   : > { %v1249_v46 = vpop.xlane.xlu0 %1248 }
 0x534   : > { %v1464_v38 = vpop.xlane.xlu2 %1463 }
 0x535   : > { %v1468_v39 = vsub.f32 %v1460_v20, %v1464_v38 }
 0x537   : > { %v1470_v40 = vmul.f32 1.442695, %v1468_v39 }
 0x539   : > { %2742 = vpow2.f32 %v1470_v40  ;;  %v2718_v40 = vld [vmem:[%s3511_s19] ss:$0 sm:$0xff] }
 0x53c   : > { %v1467_v41 = vpop.xlane.xlu1 %1466  ;;  %v1366_v42 = vpop.xlane.xlu2 %1365 }
 0x53d   : > { %v1368_v43 = vsub.f32 %v1360_v26, %v1366_v42  ;;  %v1469_v47 = vsub.f32 %v1461_v29, %v1467_v41  ;;  %v2600_v26 = vld [vmem:[%s3078_s29 + $0x20] sm:$0xff] }
 0x53e   : > { %1427 = vmatpush.bf16.msra.mxu1 %v2600_v26 }
 0x53f   : > { %v2743_v44 = vpop.eup %2742  ;;  %v1371_v45 = vmul.f32 1.442695, %v1368_v43  ;;  %v1472_v49 = vmul.f32 1.442695, %v1469_v47 }
 0x540   : > { %v1474_v48 = vsel %vm1161_vm9, %v2743_v44, 0.0 }
 0x541   : > { %1475 = vadd.xlane.f32.xlu1 %v1474_v48  ;;  %2744 = vpow2.f32 %v1371_v45 }
 0x542   : > { %2746 = vrcp.f32 %v1249_v46 }
 0x544   : > { %v1246_v50 = vpop.xlane.xlu1 %1245  ;;  %v1257_v51 = vpop.permute.xlu2 %1256 }
 0x545   : > { %2748 = vrcp.f32 %v1246_v50  ;;  %1269 = vmatpush.bf16.msrb.mxu0 %v1257_v51  ;;  %v2619_v50 = vld [vmem:[%s3093_s14 + $0x74] sm:$0xf0]  ;;  %v2618_v51 = vld [vmem:[%s3093_s14 + $0x74] sm:$0xf] }
 0x546   : > { %2750 = vpow2.f32 %v1472_v49  ;;  %v2489_v49 = vld [vmem:[%s3093_s14 + $0x70] sm:$0xf] }
 0x547   : > { %v2745_v52 = vpop.eup %2744 }
 0x548   : > { %v2747_v53 = vpop.eup %2746  ;;  %v1376_v54 = vsel %vm1161_vm9, %v2745_v52, 0.0 }
 0x549   : > { %1377 = vadd.xlane.f32.xlu0 %v1376_v54  ;;  %v1253_v56 = vmul.f32 %v2747_v53, %v2737_v14  ;;  %v2491_v53 = vld [vmem:[%s3093_s14 + $0x78] sm:$0xf0] }
 0x54a   : > { %v2494_v54 = vor.u32 %v2618_v51, %v2491_v53 }
 0x54b   : > { %v2749_v55 = vpop.eup %2748 }
 0x54c   : > { %v1252_v57 = vmul.f32 %v2749_v55, %v2739_v34  ;;  %v2751_v58 = vpop.eup %2750  ;;  %v1375_v63 = vpop.xlane.xlu1 %1374  ;;  %1720 = vmatpush.bf16.msrb.mxu2 %v2494_v54  ;;  %v2617_v55 = vld [vmem:[%s3093_s14 + $0x64] sm:$0xf0] }
 0x54d   : > { %v1477_v60 = vsel %vm1161_vm9, %v2751_v58, 0.0 }
 0x54e   : > { %v1254_v59 = vpack.c.bf16 %v1253_v56, %v1252_v57  ;;  %v2616_v56 = vld [vmem:[%s3093_s14 + $0x64] sm:$0xf] }
 0x550   : > { %2390 = vmatmul.msk.bf16.vlgmr.msrb.gmra.mxu0 %vm1161_vm9, %v1254_v59 }
 0x551   : > { %1478 = vadd.xlane.f32.xlu0 %v1477_v60  ;;  %v2473_v60 = vld [vmem:[%s3093_s14 + $0x50] sm:$0xf] }
 0x55a   : > { %1485 = vrot.lane.b32.xlu1 %v3218_v24, %s2877_s21 }
 0x565   : > { %1384 = vrot.lane.b32.xlu0 %v3218_v24, %s2876_s6 }
 0x5b4   : > { %v1476_v1 = vpop.xlane.xlu1 %1475 }
 0x5b5   : > { %2752 = vrcp.f32 %v1476_v1 }
 0x5bb   : > { %v2753_v3 = vpop.eup %2752 }
 0x5bc   : > { %v1378_v0 = vpop.xlane.xlu0 %1377  ;;  %v1482_v7 = vmul.f32 %v2753_v3, %v2743_v44  ;;  %v2613_v3 = vld [vmem:[%s3093_s14 + $0x44] sm:$0xf0] }
 0x5c4   : > { %v1479_v2 = vpop.xlane.xlu0 %1478 }
 0x5c5   : > { %2754 = vrcp.f32 %v1479_v2  ;;  %v2465_v2 = vld [vmem:[%s3093_s14 + $0x40] sm:$0xf] }
 0x5c6   : > { %2756 = vrcp.f32 %v1378_v0  ;;  %v2475_v0 = vld [vmem:[%s3093_s14 + $0x58] sm:$0xf0] }
 0x5c7   : > { %2758 = vrcp.f32 %v1375_v63  ;;  %v2474_v63 = vor.u32 %v2615_v61, %v2473_v60  ;;  %v2478_v1 = vor.u32 %v2614_v62, %v2475_v0 }
 0x5cb   : > { %v2755_v5 = vpop.eup %2754 }
 0x5cc   : > { %v1486_v6 = vpop.permute.xlu1 %1485  ;;  %v1483_v8 = vmul.f32 %v2755_v5, %v2751_v58  ;;  %v2757_v11 = vpop.eup %2756  ;;  %v2483_v58 = vld [vmem:[%s3093_s14 + $0x68] sm:$0xf0]  ;;  %v2612_v5 = vld [vmem:[%s3093_s14 + $0x44] sm:$0xf] }
 0x5cd   : > { %v1271_v10 = vpop.f32.mrf.mxu0  ;;  %1498 = vmatpush.bf16.msra.mxu3 %v1486_v6  ;;  %v2759_v12 = vpop.eup %2758  ;;  %v1382_v16 = vmul.f32 %v2757_v11, %v2745_v52  ;;  %v2490_v52 = vor.u32 %v2619_v50, %v2489_v49  ;;  %v2486_v59 = vor.u32 %v2616_v56, %v2483_v58  ;;  %v2466_v6 = vor.u32 %v2613_v3, %v2465_v2  ;;  %v2610_v11 = vld [vmem:[%s3093_s14 + $0x34] sm:$0xf] }
 0x5ce   : > { %v1484_v24 = vpack.c.bf16 %v1483_v8, %v1482_v7  ;;  %v1381_v19 = vmul.f32 %v2759_v12, %v3254_v36  ;;  %v2467_v7 = vld [vmem:[%s3093_s14 + $0x48] sm:$0xf0] }
 0x5cf   : > { %1721 = vmatpush.bf16.msrb.mxu2 %v2486_v59  ;;  %v2470_v8 = vor.u32 %v2612_v5, %v2467_v7 }
 0x5d0   : > { %2421 = vmatmul.msk.bf16.vlgmr.msra.gmra.mxu3 %vm1161_vm9, %v1484_v24  ;;  %v1383_v21 = vpack.c.bf16 %v1382_v16, %v1381_v19  ;;  %v2611_v24 = vld [vmem:[%s3093_s14 + $0x34] sm:$0xf0]  ;;  %v2449_v19 = vld [vmem:[%s3093_s14 + $0x20] sm:$0xf] }
 0x5d3   : > { %1722 = vmatpush.bf16.msrb.mxu2 %v2478_v1  ;;  %v2719_v1 = vld [vmem:[%s3512_s0] ss:$0 sm:$0xff] }
 0x5d5   : > { %v1273_v14 = vpop.f32.mrf.mxu0 }
 0x5d6   : > { %v1276_v18 = vpack.c.bf16 %v1273_v14, %v1271_v10  ;;  %v2457_v10 = vld [vmem:[%s3093_s14 + $0x30] sm:$0xf]  ;;  %v2459_v14 = vld [vmem:[%s3093_s14 + $0x38] sm:$0xf0] }
 0x5d7   : > { %v1385_v20 = vpop.permute.xlu0 %1384  ;;  %1723 = vmatpush.bf16.msrb.mxu2 %v2470_v8  ;;  %v2458_v12 = vor.u32 %v2611_v24, %v2457_v10  ;;  %v2462_v16 = vor.u32 %v2610_v11, %v2459_v14  ;;  %v2720_v8 = vld [vmem:[%s3514_s1] ss:$0 sm:$0xff]  ;;  %v2627_v14 = vld [vmem:[%s3103_s20 + $0x38] sm:$0xff] }
 0x5d8   : > { %2399 = vmatmul.msk.bf16.vlgmr.msrb.gmra.mxu1 %vm1138_vm8, %v1276_v18  ;;  %1397 = vmatpush.bf16.msra.mxu0 %v1385_v20  ;;  %v2609_v20 = vld [vmem:[%s3093_s14 + $0x24] sm:$0xf0] }
 0x5d9   : > { %1706 = vmatpush.bf16.msrb.mxu1 %v2490_v52  ;;  %1904 = vmatpush.bf16.msrb.mxu3 %v2627_v14 }
 0x5db   : > { %2410 = vmatmul.msk.bf16.vlgmr.msra.gmra.mxu0 %vm1161_vm9, %v1383_v21  ;;  %1724 = vmatpush.bf16.msrb.mxu2 %v2462_v16  ;;  %v2608_v21 = vld [vmem:[%s3093_s14 + $0x24] sm:$0xf]  ;;  %v2626_v16 = vld [vmem:[%s3103_s20 + $0x30] sm:$0xff] }
 0x5dc   : > { %1527 = vmatpush.bf16.msrb.mxu0 %v2603_v22 }
 0x5dd   : > { %1905 = vmatpush.bf16.msrb.mxu3 %v2626_v16 }
 0x5e0   : > { %1528 = vmatpush.bf16.msrb.mxu0 %v2602_v23  ;;  %v2450_v23 = vor.u32 %v2609_v20, %v2449_v19  ;;  %v2625_v19 = vld [vmem:[%s3103_s20 + $0x28] sm:$0xff]  ;;  %v2634_v20 = vld [vmem:[%s3103_s20 + $0x70] sm:$0xff] }
 0x5e1   : > { %1906 = vmatpush.bf16.msrb.mxu3 %v2625_v19 }
 0x653   : > { %v1500_v27 = vpop.f32.mrf.mxu3 }
 0x655   : > { %v1301_v33 = vpop.f32.mrf.mxu1 }
 0x656   : > { %v1331_v35 = vadd.f32 %v3245_v9, %v1301_v33 }
 0x658   : > { %v1399_v28 = vpop.f32.mrf.mxu0 }
 0x65b   : > { %v1502_v29 = vpop.f32.mrf.mxu3 }
 0x65c   : > { %v1505_v30 = vpack.c.bf16 %v1502_v29, %v1500_v27  ;;  %v2454_v27 = vor.u32 %v2608_v21, %v2451_v25  ;;  %v2624_v21 = vld [vmem:[%s3103_s20 + $0x20] sm:$0xff] }
 0x65d   : > { %v1303_v34 = vpop.f32.mrf.mxu1  ;;  %1907 = vmatpush.bf16.msrb.mxu3 %v2624_v21  ;;  %v2632_v25 = vld [vmem:[%s3103_s20 + $0x60] sm:$0xff] }
 0x65e   : > { %2430 = vmatmul.msk.bf16.vlgmr.msrb.gmra.mxu0 %vm1138_vm8, %v1505_v30  ;;  %v1333_v42 = vadd.f32 %v3247_v13, %v1303_v34  ;;  %1725 = vmatpush.bf16.msrb.mxu2 %v2454_v27  ;;  %v2441_v30 = vld [vmem:[%s3093_s14 + $0x10] sm:$0xf]  ;;  %v2631_v27 = vld [vmem:[%s3103_s20 + $0x58] sm:$0xff] }
 0x660   : > { %v1401_v31 = vpop.f32.mrf.mxu0 }
 0x661   : > { %v1404_v32 = vpack.c.bf16 %v1401_v31, %v1399_v28  ;;  %v2607_v31 = vld [vmem:[%s3093_s14 + $0x14] sm:$0xf0] }
 0x662   : > { %v2442_v34 = vor.u32 %v2607_v31, %v2441_v30  ;;  %v1620_v30 = vld [vmem:[%s3098_s15] sm:$0x3] }
 0x663   : > { %2419 = vmatmul.msk.bf16.vlgmr.msra.gmra.mxu1 %vm1138_vm8, %v1404_v32  ;;  %v2606_v32 = vld [vmem:[%s3093_s14 + $0x14] sm:$0xf]  ;;  %v2620_v31 = vld [vmem:[%s3103_s20] sm:$0xff] }
 0x6db   : > { %v1530_v36 = vpop.f32.mrf.mxu0 }
 0x6e0   : > { %v1429_v37 = vpop.f32.mrf.mxu1 }
 0x6e1   : > { %v1434_v38 = vadd.f32 %v1429_v37, %v1331_v35  ;;  %v2443_v35 = vld [vmem:[%s3093_s14 + $0x18] sm:$0xf0]  ;;  %v2433_v37 = vld [vmem:[%s3093_s14] sm:$0xf] }
 0x6e3   : > { %v1535_v39 = vadd.f32 %v1530_v36, %v1434_v38  ;;  %v1532_v46 = vpop.f32.mrf.mxu0  ;;  %v2446_v36 = vor.u32 %v2606_v32, %v2443_v35  ;;  %v2605_v38 = vld [vmem:[%s3093_s14 + $0x4] sm:$0xf0]  ;;  %v1622_v32 = vperm.slane %v1620_v30, 0 }
 0x6e5   : > { %v1537_v41 = vadd.f32 %v1535_v39, %v3136_v15  ;;  %v2604_v39 = vld [vmem:[%s3093_s14 + $0x4] sm:$0xf]  ;;  %1726 = vmatpush.bf16.msrb.mxu2 %v2446_v36 }
 0x6e6   : > { %v2628_v36 = vld [vmem:[%s3103_s20 + $0x40] sm:$0xff] }
 0x6e7   : > { %v3288_v43 = vadd.f32 %v2718_v40, %v1537_v41  ;;  %v2434_v41 = vor.u32 %v2605_v38, %v2433_v37  ;;  %v1623_v38 = vperm.slane %v1620_v30, 1 }
 0x6e8   : > { %v1431_v44 = vpop.f32.mrf.mxu1 }
 0x6e9   : > { %v1435_v9 = vadd.f32 %v1431_v44, %v1333_v42  ;;  %1547 = vadd.xlane.f32.xlu2 %v3288_v43  ;;  %v1553_v45 = vmul.f32 %v3288_v43, %v3288_v43  ;;  %v2435_v42 = vld [vmem:[%s3093_s14 + $0x8] sm:$0xf0] }
 0x6eb   : > { %v1536_v47 = vadd.f32 %v1532_v46, %v1435_v9  ;;  %1555 = vadd.xlane.f32.xlu1 %v1553_v45  ;;  %v2438_v9 = vor.u32 %v2604_v39, %v2435_v42 }
 0x6ed   : > { %v1538_v15 = vadd.f32 %v1536_v47, %v3141_v17  ;;  %v2481_v17 = vld [vmem:[%s3093_s14 + $0x60] sm:$0xf]  ;;  %1727 = vmatpush.bf16.msrb.mxu2 %v2438_v9 }
 0x6ee   : > { %v2482_v57 = vor.u32 %v2617_v55, %v2481_v17 }
 0x6ef   : > { %v3294_v13 = vadd.f32 %v2718_v40, %v1538_v15 }
 0x6f0   : > { %1707 = vmatpush.bf16.msrb.mxu1 %v2482_v57 }
 0x6f1   : > { %1549 = vadd.xlane.f32.xlu0 %v3294_v13  ;;  %v1554_v48 = vmul.f32 %v3294_v13, %v3294_v13 }
 0x6f3   : > { %1557 = vadd.xlane.f32.xlu2 %v1554_v48 }
 0x6f4   : > { %1708 = vmatpush.bf16.msrb.mxu1 %v2474_v63 }
 0x6f8   : > { %1709 = vmatpush.bf16.msrb.mxu1 %v2466_v6 }
 0x6fc   : > { %1710 = vmatpush.bf16.msrb.mxu1 %v2458_v12 }
 0x700   : > { %1711 = vmatpush.bf16.msrb.mxu1 %v2450_v23  ;;  %v2623_v23 = vld [vmem:[%s3103_s20 + $0x18] sm:$0xff] }
 0x701   : > { %1908 = vmatpush.bf16.msrb.mxu3 %v2623_v23 }
 0x704   : > { %1712 = vmatpush.bf16.msrb.mxu1 %v2442_v34 }
 0x708   : > { %1713 = vmatpush.bf16.msrb.mxu1 %v2434_v41 }
 0x75c   : > { %v1548_v18 = vpop.xlane.xlu2 %1547 }
 0x75d   : > { %v1551_v22 = vmul.f32 %v1548_v18, %v3176_v4  ;;  %v2635_v18 = vld [vmem:[%s3103_s20 + $0x78] sm:$0xff] }
 0x75e   : > { %v1556_v26 = vpop.xlane.xlu1 %1555  ;;  %1918 = vmatpush.bf16.msra.mxu0 %v2635_v18 }
 0x75f   : > { %v1561_v28 = vmul.f32 %v1551_v22, %v1551_v22  ;;  %v1559_v29 = vmul.f32 %v1556_v26, %v3176_v4  ;;  %v1567_v62 = vsub.f32 %v3288_v43, %v1551_v22  ;;  %v2633_v22 = vld [vmem:[%s3103_s20 + $0x68] sm:$0xff]  ;;  %v2622_v26 = vld [vmem:[%s3103_s20 + $0x10] sm:$0xff] }
 0x760   : > { %1909 = vmatpush.bf16.msrb.mxu3 %v2622_v26 }
 0x761   : > { %v1563_v33 = vsub.f32 %v1559_v29, %v1561_v28  ;;  %v2621_v28 = vld [vmem:[%s3103_s20 + $0x8] sm:$0xff]  ;;  %v2630_v29 = vld [vmem:[%s3103_s20 + $0x50] sm:$0xff] }
 0x762   : > { %1919 = vmatpush.bf16.msra.mxu0 %v2634_v20  ;;  %v2721_v20 = vld [vmem:[%s780_s18] ss:$0 sm:$0xff] }
 0x763   : > { %v1565_v40 = vmax.f32 %v1563_v33, 0.0  ;;  %v2629_v33 = vld [vmem:[%s3103_s20 + $0x48] sm:$0xff] }
 0x764   : > { %v1550_v44 = vpop.xlane.xlu0 %1549  ;;  %1910 = vmatpush.bf16.msrb.mxu3 %v2621_v28 }
 0x765   : > { %v1569_v45 = vadd.f32 1e-05, %v1565_v40  ;;  %v1552_v46 = vmul.f32 %v1550_v44, %v3176_v4 }
 0x766   : > { %v1558_v47 = vpop.xlane.xlu2 %1557  ;;  %1920 = vmatpush.bf16.msra.mxu0 %v2633_v22 }
 0x767   : > { %2760 = vrsqrt.f32 %v1569_v45  ;;  %v1562_v15 = vmul.f32 %v1552_v46, %v1552_v46  ;;  %v1560_v48 = vmul.f32 %v1558_v47, %v3176_v4  ;;  %vm1577_vm11 = vweird.f32 %v1569_v45 }
 0x768   : > { %v1568_v3 = vsub.f32 %v3294_v13, %v1552_v46  ;;  %1911 = vmatpush.bf16.msrb.mxu3 %v2620_v31 }
 0x769   : > { %v1564_v49 = vsub.f32 %v1560_v48, %v1562_v15 }
 0x76a   : > { %1921 = vmatpush.bf16.msra.mxu0 %v2632_v25 }
 0x76b   : > { %v1566_v50 = vmax.f32 %v1564_v49, 0.0 }
 0x76d   : > { %v2761_v51 = vpop.eup %2760  ;;  %v1570_v53 = vadd.f32 1e-05, %v1566_v50 }
 0x76e   : > { %v1572_v52 = vmul.f32 %v2761_v51, %v1569_v45  ;;  %vm1578_vm10 = vweird.f32 %v2761_v51  ;;  %1922 = vmatpush.bf16.msra.mxu0 %v2631_v27 }
 0x76f   : > { %2762 = vrsqrt.f32 %v1570_v53  ;;  %vm1579_vm12 = vmor %vm1577_vm11, %vm1578_vm10  ;;  %vm1587_vm14 = vweird.f32 %v1570_v53 }
 0x770   : > { %v1573_v54 = vmul.f32 %v2761_v51, %v1572_v52 }
 0x772   : > { %v1574_v17 = vmul.f32 0.5, %v1573_v54  ;;  %1923 = vmatpush.bf16.msra.mxu0 %v2630_v29 }
 0x774   : > { %v1575_v55 = vsub.f32 1.5, %v1574_v17 }
 0x775   : > { %v2763_v56 = vpop.eup %2762 }
 0x776   : > { %v1576_v57 = vmul.f32 %v2761_v51, %v1575_v55  ;;  %v1582_v58 = vmul.f32 %v2763_v56, %v1570_v53  ;;  %vm1588_vm13 = vweird.f32 %v2763_v56  ;;  %1924 = vmatpush.bf16.msra.mxu0 %v2629_v33 }
 0x777   : > { %vm1589_vm15 = vmor %vm1587_vm14, %vm1588_vm13 }
 0x778   : > { %v1583_v59 = vmul.f32 %v2763_v56, %v1582_v58  ;;  %v1580_v60 = vsel %vm1579_vm12, %v2761_v51, %v1576_v57 }
 0x779   : > { %v1591_v0 = vmul.f32 %v1580_v60, %v1567_v62 }
 0x77a   : > { %v1584_v61 = vmul.f32 0.5, %v1583_v59  ;;  %1925 = vmatpush.bf16.msra.mxu0 %v2628_v36 }
 0x77b   : > { %v1596_v7 = vmul.f32 %v2719_v1, %v1591_v0 }
 0x77c   : > { %v1585_v63 = vsub.f32 1.5, %v1584_v61 }
 0x77d   : > { %v1601_v24 = vadd.f32 %v2720_v8, %v1596_v7 }
 0x77e   : > { %v1586_v2 = vmul.f32 %v2763_v56, %v1585_v63 }
 0x780   : > { %v1590_v5 = vsel %vm1589_vm15, %v2763_v56, %v1586_v2 }
 0x781   : > { %v1592_v6 = vmul.f32 %v1590_v5, %v1568_v3 }
 0x783   : > { %v1597_v10 = vmul.f32 %v2719_v1, %v1592_v6 }
 0x785   : > { %v1602_v11 = vadd.f32 %v2720_v8, %v1597_v10 }
 0x787   : > { %v1603_v12 = vpack.c.bf16 %v1602_v11, %v1601_v24 }
 0x789   : > { %1714 = vmatmul.bf16.vlgmr.msrb.gmra.mxu1 %v1603_v12  ;;  %1728 = vmatmul.bf16.vlgmr.msrb.gmra.mxu2 %v1603_v12 }
 0x806   : > { %v1715_v34 = vpop.f32.mrf.mxu1 }
 0x807   : > { %v1716_v35 = vadd.f32 %v1715_v34, %v1622_v32 }
 0x809   : > { %v1738_v37 = vmul.f32 0.044715, %v1716_v35  ;;  %v1734_v1 = vmul.f32 0.5, %v1716_v35 }
 0x80b   : > { %v1742_v39 = vmul.f32 %v1738_v37, %v1716_v35 }
 0x80c   : > { %v1729_v40 = vpop.f32.mrf.mxu2 }
 0x80d   : > { %v1746_v41 = vmul.f32 %v1742_v39, %v1716_v35  ;;  %v1730_v42 = vadd.f32 %v1729_v40, %v1623_v38 }
 0x80e   : > { %v1717_v44 = vpop.f32.mrf.mxu1 }
 0x80f   : > { %v1750_v9 = vadd.f32 %v1746_v41, %v1716_v35  ;;  %v1739_v45 = vmul.f32 0.044715, %v1730_v42  ;;  %v1718_v46 = vadd.f32 %v1717_v44, %v1622_v32  ;;  %v1735_v11 = vmul.f32 0.5, %v1730_v42 }
 0x811   : > { %v1743_v47 = vmul.f32 %v1739_v45, %v1730_v42  ;;  %v1740_v15 = vmul.f32 0.044715, %v1718_v46  ;;  %v1754_v48 = vmul.f32 0.7978846, %v1750_v9  ;;  %v1736_v2 = vmul.f32 0.5, %v1718_v46 }
 0x813   : > { %v1747_v49 = vmul.f32 %v1743_v47, %v1730_v42  ;;  %v1744_v50 = vmul.f32 %v1740_v15, %v1718_v46  ;;  %2764 = vtanh.f32 %v1754_v48 }
 0x814   : > { %v1731_v51 = vpop.f32.mrf.mxu2 }
 0x815   : > { %v1751_v52 = vadd.f32 %v1747_v49, %v1730_v42  ;;  %v1748_v53 = vmul.f32 %v1744_v50, %v1718_v46  ;;  %v1732_v54 = vadd.f32 %v1731_v51, %v1623_v38 }
 0x817   : > { %v1752_v17 = vadd.f32 %v1748_v53, %v1718_v46  ;;  %v1741_v55 = vmul.f32 0.044715, %v1732_v54  ;;  %v1755_v56 = vmul.f32 0.7978846, %v1751_v52  ;;  %v1737_v12 = vmul.f32 0.5, %v1732_v54 }
 0x819   : > { %v1756_v57 = vmul.f32 0.7978846, %v1752_v17  ;;  %v1745_v58 = vmul.f32 %v1741_v55, %v1732_v54  ;;  %v2765_v60 = vpop.eup %2764 }
 0x81a   : > { %v1762_v63 = vadd.f32 1.0, %v2765_v60 }
 0x81b   : > { %v1749_v59 = vmul.f32 %v1745_v58, %v1732_v54  ;;  %2766 = vtanh.f32 %v1756_v57 }
 0x81c   : > { %2768 = vtanh.f32 %v1755_v56  ;;  %v1766_v6 = vmul.f32 %v1762_v63, %v1734_v1 }
 0x81d   : > { %v1753_v61 = vadd.f32 %v1749_v59, %v1732_v54 }
 0x81f   : > { %v1757_v62 = vmul.f32 0.7978846, %v1753_v61 }
 0x821   : > { %v2767_v0 = vpop.eup %2766  ;;  %2770 = vtanh.f32 %v1757_v62 }
 0x822   : > { %v1764_v3 = vadd.f32 1.0, %v2767_v0  ;;  %v2769_v5 = vpop.eup %2768 }
 0x823   : > { %v1763_v10 = vadd.f32 1.0, %v2769_v5 }
 0x824   : > { %v1768_v7 = vmul.f32 %v1764_v3, %v1736_v2 }
 0x825   : > { %v1767_v16 = vmul.f32 %v1763_v10, %v1735_v11 }
 0x826   : > { %v1770_v8 = vpack.c.bf16 %v1768_v7, %v1766_v6 }
 0x827   : > { %v2771_v24 = vpop.eup %2770 }
 0x828   : > { %1912 = vmatmul.bf16.vlgmr.msrb.gmra.mxu3 %v1770_v8  ;;  %v1765_v14 = vadd.f32 1.0, %v2771_v24 }
 0x82a   : > { %v1769_v18 = vmul.f32 %v1765_v14, %v1737_v12 }
 0x82c   : > { %v1771_v19 = vpack.c.bf16 %v1769_v18, %v1767_v16 }
 0x82e   : > { %1926 = vmatmul.bf16.vlgmr.msra.gmra.mxu0 %v1771_v19 }
 0x8ab   : > { %v1913_v21 = vpop.f32.mrf.mxu3  ;;  %v1927_v22 = vpop.f32.mrf.mxu0 }
 0x8ac   : > { %v1914_v23 = vadd.f32 %v2721_v20, %v1913_v21 }
 0x8ae   : > { %v1928_v25 = vadd.f32 %v1927_v22, %v1914_v23 }
 0x8b0   : > { %v1932_v26 = vadd.f32 %v1928_v25, %v3288_v43 }
 0x8b2   : > { %1934 = vst [vmem:[#allocation2] sm:$0xff] %v1932_v26 }
 0x8b3   : > { %1936 = vst [vmem:[%s3113_s10] sm:$0xff] %v1932_v26  ;;  %v1915_v27 = vpop.f32.mrf.mxu3  ;;  %v1929_v29 = vpop.f32.mrf.mxu0 }
 0x8b4   : > { %v1916_v28 = vadd.f32 %v2721_v20, %v1915_v27 }
 0x8b6   : > { %v1930_v30 = vadd.f32 %v1929_v29, %v1916_v28 }
 0x8b7   : > { %1941 = sbr.rel (%p2559_p1) target bundleno = 2395 (0x95b), region = 96 }
 0x8b8   : > { %v1933_v31 = vadd.f32 %v1930_v30, %v3294_v13 }
 0x8ba   : > { %1935 = vst [vmem:[#allocation2 + $0x8] sm:$0xff] %v1933_v31 }
 0x8bb   : > { %1937 = vst [vmem:[%s3113_s10 + $0x8] sm:$0xff] %v1933_v31 }
 0x8bc   : > { %1944 = vadd.xlane.f32.xlu0 %v1932_v26  ;;  %v1950_v32 = vmul.f32 %v1932_v26, %v1932_v26  ;;  %v1951_v33 = vmul.f32 %v1933_v31, %v1933_v31  ;;  %v2773_v57 = vld [vmem:[%s3518_s26] ss:$0 sm:$0xff] }
 0x8be   : > { %1952 = vadd.xlane.f32.xlu1 %v1950_v32 }
 0x8c4   : > { %1946 = vadd.xlane.f32.xlu0 %v1933_v31 }
 0x8c6   : > { %1954 = vadd.xlane.f32.xlu1 %v1951_v33 }
 0x92f   : > { %v1945_v43 = vpop.xlane.xlu0 %1944 }
 0x930   : > { %v1948_v34 = vmul.f32 %v1945_v43, %v3176_v4 }
 0x931   : > { %v1953_v35 = vpop.xlane.xlu1 %1952 }
 0x932   : > { %v1958_v36 = vmul.f32 %v1948_v34, %v1948_v34  ;;  %v1956_v37 = vmul.f32 %v1953_v35, %v3176_v4  ;;  %v1964_v54 = vsub.f32 %v1932_v26, %v1948_v34 }
 0x934   : > { %v1960_v38 = vsub.f32 %v1956_v37, %v1958_v36 }
 0x936   : > { %v1962_v13 = vmax.f32 %v1960_v38, 0.0 }
 0x937   : > { %v1947_v39 = vpop.xlane.xlu0 %1946 }
 0x938   : > { %v1966_v40 = vadd.f32 1e-05, %v1962_v13  ;;  %v1949_v41 = vmul.f32 %v1947_v39, %v3176_v4 }
 0x939   : > { %v1955_v42 = vpop.xlane.xlu1 %1954 }
 0x93a   : > { %2774 = vrsqrt.f32 %v1966_v40  ;;  %v1959_v44 = vmul.f32 %v1949_v41, %v1949_v41  ;;  %v1957_v9 = vmul.f32 %v1955_v42, %v3176_v4  ;;  %vm1974_vm1 = vweird.f32 %v1966_v40  ;;  %v2772_v4 = vld [vmem:[%s3517_s25] ss:$0 sm:$0xff] }
 0x93b   : > { %v1965_v0 = vsub.f32 %v1933_v31, %v1949_v41 }
 0x93c   : > { %v1961_v45 = vsub.f32 %v1957_v9, %v1959_v44 }
 0x93e   : > { %v1963_v46 = vmax.f32 %v1961_v45, 0.0 }
 0x940   : > { %v2775_v47 = vpop.eup %2774  ;;  %v1967_v48 = vadd.f32 1e-05, %v1963_v46 }
 0x941   : > { %v1969_v15 = vmul.f32 %v2775_v47, %v1966_v40  ;;  %vm1975_vm0 = vweird.f32 %v2775_v47 }
 0x942   : > { %2776 = vrsqrt.f32 %v1967_v48  ;;  %vm1976_vm2 = vmor %vm1974_vm1, %vm1975_vm0  ;;  %vm1984_vm4 = vweird.f32 %v1967_v48 }
 0x943   : > { %v1970_v49 = vmul.f32 %v2775_v47, %v1969_v15 }
 0x945   : > { %v1971_v50 = vmul.f32 0.5, %v1970_v49 }
 0x947   : > { %v1972_v51 = vsub.f32 1.5, %v1971_v50 }
 0x948   : > { %v2777_v52 = vpop.eup %2776 }
 0x949   : > { %v1973_v53 = vmul.f32 %v2775_v47, %v1972_v51  ;;  %v1979_v17 = vmul.f32 %v2777_v52, %v1967_v48  ;;  %vm1985_vm3 = vweird.f32 %v2777_v52 }
 0x94a   : > { %vm1986_vm5 = vmor %vm1984_vm4, %vm1985_vm3 }
 0x94b   : > { %v1977_v55 = vsel %vm1976_vm2, %v2775_v47, %v1973_v53  ;;  %v1980_v58 = vmul.f32 %v2777_v52, %v1979_v17 }
 0x94c   : > { %v1988_v56 = vmul.f32 %v1977_v55, %v1964_v54 }
 0x94d   : > { %v1981_v60 = vmul.f32 0.5, %v1980_v58 }
 0x94e   : > { %v1993_v59 = vmul.f32 %v2772_v4, %v1988_v56 }
 0x94f   : > { %v1982_v62 = vsub.f32 1.5, %v1981_v60 }
 0x950   : > { %v1998_v61 = vadd.f32 %v2773_v57, %v1993_v59 }
 0x951   : > { %v1983_v63 = vmul.f32 %v2777_v52, %v1982_v62 }
 0x952   : > { %2000 = vst [vmem:[%s3115_s16] sm:$0xff] %v1998_v61 }
 0x953   : > { %v1987_v1 = vsel %vm1986_vm5, %v2777_v52, %v1983_v63 }
 0x954   : > { %v1989_v2 = vmul.f32 %v1987_v1, %v1965_v0 }
 0x956   : > { %v1994_v3 = vmul.f32 %v2772_v4, %v1989_v2 }
 0x958   : > { %v1999_v5 = vadd.f32 %v2773_v57, %v1994_v3 }
 0x95a   : > { %2001 = vst [vmem:[%s3115_s16 + $0x8] sm:$0xff] %v1999_v5 }
 0x95b PF: > { %s3519_s6 = sld [smem:[#allocation10_spill]]  ;;  %s2027_s0 = sshll.u32 %s3115_s16, 4  ;;  %s2028_s0 = int_to_ptr.vmem [resolvable:$true] %s2027_s0 }
 0x95c   : > { %s3520_s21 = sld [smem:[#allocation7_spill]] }
 0x95d   : > { %s3522_s14 = sld [smem:[#allocation32_spill]] }
 0x961   : > { %s2636_s7 = sshll.u32 %s3519_s6, 4 }
 0x962   : > { %s3523_s27 = sand.u32 1, %s3520_s21  }
 0x963   : > { %s2026_s28 = scalar_lea.hbm %s3522_s14, %s2636_s7  ;;  %s2012_s22 = scalar_lea.sflag [#allocation4], %s3523_s27 }
 0x964   : > { %s2029_s8 = sshll.u32 %s2026_s28, 4  ;;  %s2798_s17 = scalar_lea.hbm %s3522_s14, 32  ;;  %s2030_s8 = int_to_ptr.hbm [resolvable:$true] %s2029_s8 }
 0x965   : > { %s2792_s1 = sshra.s32 %s2030_s8, 4  ;;  %s2793_s1 = int_to_ptr.hbm [resolvable:$true] %s2792_s1 }
 0x966   : > { %s2794_s15 = scalar_lea.hbm %s2793_s1, 16  ;;  %p2799_p6 = scmp.lt.s32.totalorder %s2793_s1, %s3522_s14 }
 0x967   : > { %p2795_p2 = scmp.ne.s32.totalorder %s2793_s1, %s2794_s15  ;;  %p2800_p7 = scmp.lt.s32.totalorder %s2798_s17, %s2794_s15 }
 0x969   : > { %p2796_p4 = pnand %p2795_p2, %p3024_p3  ;;  %p2801_p8 = por %p2800_p7, %p2799_p6 }
 0x96b   : > { %p2797_p5 = pneg %p2796_p4 }
 0x96d   : > { %p2802_p10 = pnand %p2801_p8, %p2797_p5 }
 0x96f   : > { %2805 = shalt.err (!%p2802_p10)
}
 0x970   : > { %s2878_s16 = smov 128   ;;  %s2879_s25 = smov 8  }
 0x971   : > { %2638 = dma.vmem_to_hbm [thread:$0]  (%p3024_p3), %s2028_s0, 256, %s2030_s8, %s2012_s22, %s2878_s16, %s2878_s16, %s2879_s25  }
 0x972 PF: > { %s3524_s3 = sld [smem:[#allocation13_spill]] }
 0x973   : > { %s3525_s23 = sld [smem:[#allocation6_spill]] }
 0x978   : > { %p2644_p11 = scmp.ge.s32.totalorder %s3524_s3, 2 }
 0x979   : > { %s2056_s6 = sand.u32 1, %s3525_s23  }
 0x97a   : > { %p2641_p12 = pnand %p2644_p11, %p3034_p9  ;;  %s2057_s21 = scalar_lea.sflag [#allocation4], %s2056_s6 }
 0x97c   : > { %p2642_p13 = pneg %p2641_p12 }
 0x97e   : > { %2839 = dma.done.wait (%p2642_p13), %s2057_s21, 256  }
 0x97f   : > { %2841 = vsyncadd (%p2642_p13), %s2057_s21, 4294967040  ;;  %s32_s20 = sadd.s32 1, %s3524_s3   ;;  %s3527_s27 = sld [smem:[#allocation7_spill]] }
 0x980   : > { %p29_p0 = scmp.ge.s32.totalorder %s32_s20, 6   ;;  %s3528_s28 = sld [smem:[#allocation8_spill]] }
 0x981   : > { %s3529_s29 = sld [smem:[#allocation18_spill]] }
 0x982   : > { %s3530_s30 = sld [smem:[#allocation11_spill]]  ;;  %31 = sbr.rel (!%p29_p0) target bundleno = 20 (0x14), region = 176 }
 0x983   : > { %s3531_s0 = sld [smem:[#allocation12_spill]] }
 0x984   : > { %s3532_s19 = sld [smem:[#allocation14_spill]] }
 0x985   : > { %s3533_s1 = sld [smem:[#allocation16_spill]] }
 0x987   :  { %2063 = vsyncpa [#allocation4], 1 }
 0x988   :  { %2065 = vsyncpa [#allocation4 + $0x1], 1 }

</bundles_post_ra>
